<compile_context>
chip_gen: v7x
topology: tpu7x:2x2x1
jax: 0.10.0
libtpu: 0.0.40
codegen_flags: <defaults>
</compile_context>

<pallas_src>
import functools

import jax
import jax.numpy as jnp
from jax.experimental import pallas as pl
from jax.experimental.pallas import tpu as pltpu


def _bottleneck_kernel(mcol_ref, x_ref, w1s_ref, w2g_ref, w3_ref,
                       ab_ref, ao_ref,
                       g1_ref, b1_ref, g2_ref, b2_ref, g3_ref, b3_ref,
                       gs_ref, bs_ref,
                       out_ref, hbuf, *, W, PADW, eps):
    """Processes Bt batch elements per grid step.

    mcol_ref : (2, P)            column-validity masks for dx=-1 / dx=+1 ({0,1})
    x_ref    : (Bt, Cin, P)      input (bf16), spatial flattened (p = y*W + x)
    w1s_ref  : (Cb+Cout, Cin)    conv1 and shortcut 1x1 weights stacked (bf16)
    w2g_ref  : (3, Cb, 3*Cb)     3x3 weights, dy-major / (dx, cin)-minor (bf16)
    w3_ref   : (Cout, Cb)        conv3 1x1 weight (bf16)
    ab/ao    : (C, C)            group-averaging matrices, entries 1/((C/G)*P) (f32)
    g*/b*    : (C, 1)            GroupNorm affine weight / bias (f32)
    out_ref  : (Bt, Cout, P)     output (f32)
    hbuf     : (3*Cb, P+2*PADW)  bf16 VMEM scratch holding the dx-shifted copies
    """
    Bt, _, P = x_ref.shape
    Cb = ab_ref.shape[0]

    # ---- batch-invariant loads / casts, hoisted out of the per-sample loop -------
    mask_l = mcol_ref[0:1, :].astype(jnp.bfloat16)      # valid when x-1 >= 0
    mask_r = mcol_ref[1:2, :].astype(jnp.bfloat16)      # valid when x+1 <= W-1
    w1s = w1s_ref[...]
    w3 = w3_ref[...]
    a_b = ab_ref[...]
    a_o = ao_ref[...]
    g1 = g1_ref[...]; b1 = b1_ref[...]
    g2 = g2_ref[...]; b2 = b2_ref[...]
    g3 = g3_ref[...]; b3 = b3_ref[...]
    gs = gs_ref[...]; bs = bs_ref[...]

    # Zero only the halo borders; the middle [PADW, PADW+P) is fully overwritten for
    # every sample.  Done every grid step (scratch is per-TensorCore under megacore).
    hbuf[:, 0:PADW] = jnp.zeros((3 * Cb, PADW), hbuf.dtype)
    hbuf[:, PADW + P:PADW + P + PADW] = jnp.zeros((3 * Cb, PADW), hbuf.dtype)

    def gnorm(h, a, g, b):
        # Reduce over lanes first (cheap XLU reduce), then average within groups with
        # a tiny (C,C)@(C,1) matvec.  Stats stay f32; biased var like torch GroupNorm.
        s1 = jnp.sum(h, axis=1, keepdims=True)                       # (C, 1)
        s2 = jnp.sum(h * h, axis=1, keepdims=True)                   # (C, 1)
        mu = jnp.dot(a, s1, preferred_element_type=jnp.float32)      # (C, 1)
        m2 = jnp.dot(a, s2, preferred_element_type=jnp.float32)      # (C, 1)
        var = jnp.maximum(m2 - mu * mu, 0.0)
        inv = jax.lax.rsqrt(var + eps)
        return (h - mu) * (inv * g) + b

    def body(bi, carry):
        xb = x_ref[bi]                                               # (Cin, P) bf16

        # ---- conv1 (1x1) + projection shortcut fused: one matmul, shared RHS ----
        hs = jnp.dot(w1s, xb, preferred_element_type=jnp.float32)    # (Cb+Cout, P)
        h1 = jnp.maximum(gnorm(hs[:Cb], a_b, g1, b1), 0.0)

        # ---- conv2 (3x3, pad=1): build dx-shifted, masked copies once ------------
        h1b = h1.astype(jnp.bfloat16)
        hbuf[Cb:2 * Cb, PADW:PADW + P] = h1b                              # dx =  0
        hbuf[0:Cb, PADW:PADW + P] = (
            hbuf[Cb:2 * Cb, PADW - 1:PADW - 1 + P] * mask_l)              # dx = -1
        hbuf[2 * Cb:3 * Cb, PADW:PADW + P] = (
            hbuf[Cb:2 * Cb, PADW + 1:PADW + 1 + P] * mask_r)              # dx = +1

        # Three dy-grouped matmuls, contraction depth 3*Cb (acc init from first tap).
        acc = None
        for ky in range(3):
            off = PADW + (ky - 1) * W
            part = jnp.dot(w2g_ref[ky], hbuf[:, off:off + P],
                           preferred_element_type=jnp.float32)       # (Cb, P)
            acc = part if acc is None else acc + part
        h2 = jnp.maximum(gnorm(acc, a_b, g2, b2), 0.0)

        # ---- conv3 (1x1) + GN ----------------------------------------------------
        h3 = jnp.dot(w3, h2.astype(jnp.bfloat16),
                     preferred_element_type=jnp.float32)             # (Cout, P)
        h3 = gnorm(h3, a_o, g3, b3)

        # ---- shortcut GN, residual add, final ReLU --------------------------------
        sc = gnorm(hs[Cb:], a_o, gs, bs)
        out_ref[bi] = jnp.maximum(h3 + sc, 0.0).astype(out_ref.dtype)
        return carry

    jax.lax.fori_loop(0, Bt, body, 0)


def _group_avg_matrix(C, G, P):
    cpg = C // G
    idx = jnp.arange(C)
    same = (idx[:, None] // cpg) == (idx[None, :] // cpg)
    return jnp.where(same, 1.0 / (cpg * P), 0.0).astype(jnp.float32)


def _bcast_spec(shape):
    return pl.BlockSpec(shape, lambda b: (0,) * len(shape))


def bottleneck_block(x, w1, g1, b1, w2, g2, b2, w3, g3, b3, ws, gs, bs,
                     *, num_norm_groups, eps=1e-5, batch_block=None):
    """Forward pass of BottleneckBlock (stride=1) with GroupNorm.

    x  : (N, Cin, H, W)
    w1 : (Cb, Cin)   w2 : (Cb, Cb, 3, 3)   w3 : (Cout, Cb)   ws : (Cout, Cin)
    g*/b* : per-channel GroupNorm affine parameters.
    """
    N, Cin, H, W = x.shape
    Cb = w1.shape[0]
    Cout = w3.shape[0]
    P = H * W
    assert P % 128 == 0, "flattened spatial size must be a multiple of 128"
    assert Cb % 8 == 0 and Cout % 8 == 0, "channel counts must be sublane-aligned"
    assert Cb % num_norm_groups == 0 and Cout % num_norm_groups == 0

    if batch_block is None:
        batch_block = 1
        for cand in (8, 4, 2):      # amortize per-step overhead, keep >= 2 grid steps
            if N % cand == 0 and N // cand >= 2:
                batch_block = cand
                break
    assert N % batch_block == 0
    Bt = batch_block

    PADW = -(-W // 128) * 128       # halo width >= W, lane-aligned (handles W >= 128)

    x_flat = x.reshape(N, Cin, P).astype(jnp.bfloat16)
    # conv1 + projection shortcut stacked into one weight (shared RHS x).
    w1s = jnp.concatenate([w1, ws], axis=0).astype(jnp.bfloat16)       # (Cb+Cout, Cin)
    # (O, I, Ky, Kx) -> (Ky, O, Kx*I): dy-grouped weights; columns match the
    # [dx=-1 | dx=0 | dx=+1] channel blocks built in hbuf.
    w2g = jnp.transpose(w2, (2, 0, 3, 1)).reshape(3, Cb, 3 * Cb).astype(jnp.bfloat16)
    w3b = w3.astype(jnp.bfloat16)

    xcoord = jnp.arange(P, dtype=jnp.int32) % W
    mcol = jnp.stack([(xcoord >= 1), (xcoord <= W - 2)],
                     axis=0).astype(jnp.float32)                        # (2, P)

    a_b = _group_avg_matrix(Cb, num_norm_groups, P)     # shared by GN1 / GN2
    a_o = _group_avg_matrix(Cout, num_norm_groups, P)   # shared by GN3 / GN_shortcut

    def col(v):
        return v.astype(jnp.float32).reshape(-1, 1)

    args = (mcol, x_flat, w1s, w2g, w3b, a_b, a_o,
            col(g1), col(b1), col(g2), col(b2), col(g3), col(b3), col(gs), col(bs))

    in_specs = [
        _bcast_spec((2, P)),                              # column masks
        pl.BlockSpec((Bt, Cin, P), lambda b: (b, 0, 0)),  # input, Bt batch elements
        _bcast_spec((Cb + Cout, Cin)),                    # fused conv1+shortcut weight
        _bcast_spec((3, Cb, 3 * Cb)),                     # dy-grouped 3x3 weight
        _bcast_spec((Cout, Cb)),                          # w3
        _bcast_spec((Cb, Cb)),                            # group-avg matrix (bottleneck)
        _bcast_spec((Cout, Cout)),                        # group-avg matrix (out)
        _bcast_spec((Cb, 1)), _bcast_spec((Cb, 1)),       # g1, b1
        _bcast_spec((Cb, 1)), _bcast_spec((Cb, 1)),       # g2, b2
        _bcast_spec((Cout, 1)), _bcast_spec((Cout, 1)),   # g3, b3
        _bcast_spec((Cout, 1)), _bcast_spec((Cout, 1)),   # gs, bs
    ]

    kernel = functools.partial(_bottleneck_kernel, W=W, PADW=PADW, eps=eps)

    out_flat = pl.pallas_call(
        kernel,
        out_shape=jax.ShapeDtypeStruct((N, Cout, P), jnp.float32),
        grid_spec=pltpu.PrefetchScalarGridSpec(
            num_scalar_prefetch=0,
            grid=(N // Bt,),
            in_specs=in_specs,
            out_specs=pl.BlockSpec((Bt, Cout, P), lambda b: (b, 0, 0)),
            scratch_shapes=[pltpu.VMEM((3 * Cb, P + 2 * PADW), jnp.bfloat16)],
        ),
        compiler_params=pltpu.CompilerParams(
            dimension_semantics=("parallel",),        # batch-parallel -> both v7x TCs
            vmem_limit_bytes=32 * 1024 * 1024),
    )(*args)
    return out_flat.reshape(N, Cout, H, W)


# ------------------------------ pure-JAX reference ------------------------------

def _ref_groupnorm(x, G, gamma, beta, eps=1e-5):
    N, C, H, W = x.shape
    xg = x.reshape(N, G, C // G, H * W)
    mu = xg.mean(axis=(2, 3), keepdims=True)
    var = xg.var(axis=(2, 3), keepdims=True)           # biased, like torch GN
    xn = ((xg - mu) / jnp.sqrt(var + eps)).reshape(N, C, H, W)
    return xn * gamma[None, :, None, None] + beta[None, :, None, None]


def _ref_conv1x1(x, w):
    return jnp.einsum('oi,nihw->nohw', w, x)


def _ref_conv3x3(x, w):
    return jax.lax.conv_general_dilated(
        x, w, window_strides=(1, 1), padding=((1, 1), (1, 1)),
        dimension_numbers=('NCHW', 'OIHW', 'NCHW'))


def ref_bottleneck(x, w1, g1, b1, w2, g2, b2, w3, g3, b3, ws, gs, bs, *, G, eps=1e-5):
    h = _ref_conv1x1(x, w1)
    h = jax.nn.relu(_ref_groupnorm(h, G, g1, b1, eps))
    h = _ref_conv3x3(h, w2)
    h = jax.nn.relu(_ref_groupnorm(h, G, g2, b2, eps))
    h = _ref_conv1x1(h, w3)
    h = _ref_groupnorm(h, G, g3, b3, eps)
    s = _ref_conv1x1(x, ws)
    s = _ref_groupnorm(s, G, gs, bs, eps)
    return jax.nn.relu(h + s)


if __name__ == "__main__":
    key = jax.random.PRNGKey(0)
    ks = jax.random.split(key, 14)

    # Small shapes consistent with the module: BottleneckBlock(32 -> 64, bottleneck 16)
    N, Cin, Cb, Cout, H, W = 4, 32, 16, 64, 16, 16
    G = 8  # num_norm_groups (divides both Cb and Cout)

    x = jax.random.normal(ks[0], (N, Cin, H, W), dtype=jnp.float32)

    def msra(k, shape, fan_in):
        return jax.random.normal(k, shape, dtype=jnp.float32) * jnp.sqrt(2.0 / fan_in)

    w1 = msra(ks[1], (Cb, Cin), Cin)          # conv1: 1x1
    w2 = msra(ks[2], (Cb, Cb, 3, 3), Cb * 9)  # conv2: 3x3, pad 1
    w3 = msra(ks[3], (Cout, Cb), Cb)          # conv3: 1x1
    ws = msra(ks[4], (Cout, Cin), Cin)        # projection shortcut: 1x1

    def affine(kg, kb, C):
        return (1.0 + 0.1 * jax.random.normal(kg, (C,), dtype=jnp.float32),
                0.1 * jax.random.normal(kb, (C,), dtype=jnp.float32))

    g1, b1 = affine(ks[5], ks[6], Cb)
    g2, b2 = affine(ks[7], ks[8], Cb)
    g3, b3 = affine(ks[9], ks[10], Cout)
    gs, bs = affine(ks[11], ks[12], Cout)

    out = bottleneck_block(x, w1, g1, b1, w2, g2, b2, w3, g3, b3, ws, gs, bs,
                           num_norm_groups=G)
    out = jax.block_until_ready(out)

    ref = ref_bottleneck(x, w1, g1, b1, w2, g2, b2, w3, g3, b3, ws, gs, bs, G=G)
    assert out.shape == (N, Cout, H, W)
    max_err = float(jnp.max(jnp.abs(out - ref)))
    # bf16 MXU operands (f32 accumulation + f32 GN stats) -> relaxed tolerance.
    assert jnp.allclose(out, ref, atol=8e-2, rtol=5e-2), f"max abs err = {max_err}"

    print("KERNEL_OK")
</pallas_src>

<mosaic_0001>
module attributes {stable_mosaic.version = 11 : i64} {
  func.func @_bottleneck_kernel(%arg0: i32, %arg1: memref<2x256xf32, #tpu.memory_space<vmem>>, %arg2: memref<2x32x256xbf16, #tpu.memory_space<vmem>>, %arg3: memref<80x32xbf16, #tpu.memory_space<vmem>>, %arg4: memref<3x16x48xbf16, #tpu.memory_space<vmem>>, %arg5: memref<64x16xbf16, #tpu.memory_space<vmem>>, %arg6: memref<16x16xf32, #tpu.memory_space<vmem>>, %arg7: memref<64x64xf32, #tpu.memory_space<vmem>>, %arg8: memref<16x1xf32, #tpu.memory_space<vmem>>, %arg9: memref<16x1xf32, #tpu.memory_space<vmem>>, %arg10: memref<16x1xf32, #tpu.memory_space<vmem>>, %arg11: memref<16x1xf32, #tpu.memory_space<vmem>>, %arg12: memref<64x1xf32, #tpu.memory_space<vmem>>, %arg13: memref<64x1xf32, #tpu.memory_space<vmem>>, %arg14: memref<64x1xf32, #tpu.memory_space<vmem>>, %arg15: memref<64x1xf32, #tpu.memory_space<vmem>>, %arg16: memref<2x64x256xf32, #tpu.memory_space<vmem>>, %arg17: memref<48x512xbf16, #tpu.memory_space<vmem>>) attributes {dimension_semantics = [#tpu.dimension_semantics<parallel>], iteration_bounds = array<i64: 2>, scalar_prefetch = 0 : i64, scratch_operands = 1 : i64, tpu.core_type = #tpu.core_type<tc>, window_params = [{pipeline_mode = #tpu.pipeline_mode<synchronous>, transform_indices = @transform_0, window_bounds = array<i64: 2, 256>}, {transform_indices = @transform_1, window_bounds = array<i64: 2, 32, 256>}, {pipeline_mode = #tpu.pipeline_mode<synchronous>, transform_indices = @transform_2, window_bounds = array<i64: 80, 32>}, {pipeline_mode = #tpu.pipeline_mode<synchronous>, transform_indices = @transform_3, window_bounds = array<i64: 3, 16, 48>}, {pipeline_mode = #tpu.pipeline_mode<synchronous>, transform_indices = @transform_4, window_bounds = array<i64: 64, 16>}, {pipeline_mode = #tpu.pipeline_mode<synchronous>, transform_indices = @transform_5, window_bounds = array<i64: 16, 16>}, {pipeline_mode = #tpu.pipeline_mode<synchronous>, transform_indices = @transform_6, window_bounds = array<i64: 64, 64>}, {pipeline_mode = #tpu.pipeline_mode<synchronous>, transform_indices = @transform_7, window_bounds = array<i64: 16, 1>}, {pipeline_mode = #tpu.pipeline_mode<synchronous>, transform_indices = @transform_8, window_bounds = array<i64: 16, 1>}, {pipeline_mode = #tpu.pipeline_mode<synchronous>, transform_indices = @transform_9, window_bounds = array<i64: 16, 1>}, {pipeline_mode = #tpu.pipeline_mode<synchronous>, transform_indices = @transform_10, window_bounds = array<i64: 16, 1>}, {pipeline_mode = #tpu.pipeline_mode<synchronous>, transform_indices = @transform_11, window_bounds = array<i64: 64, 1>}, {pipeline_mode = #tpu.pipeline_mode<synchronous>, transform_indices = @transform_12, window_bounds = array<i64: 64, 1>}, {pipeline_mode = #tpu.pipeline_mode<synchronous>, transform_indices = @transform_13, window_bounds = array<i64: 64, 1>}, {pipeline_mode = #tpu.pipeline_mode<synchronous>, transform_indices = @transform_14, window_bounds = array<i64: 64, 1>}, {transform_indices = @transform_15, window_bounds = array<i64: 2, 64, 256>}]} {
    %c0 = arith.constant 0 : index
    %c0_0 = arith.constant 0 : index
    %0 = vector.load %arg1[%c0, %c0_0] : memref<2x256xf32, #tpu.memory_space<vmem>>, vector<1x256xf32>
    %1 = arith.truncf %0 : vector<1x256xf32> to vector<1x256xbf16>
    %c1 = arith.constant 1 : index
    %c0_1 = arith.constant 0 : index
    %2 = vector.load %arg1[%c1, %c0_1] : memref<2x256xf32, #tpu.memory_space<vmem>>, vector<1x256xf32>
    %3 = arith.truncf %2 : vector<1x256xf32> to vector<1x256xbf16>
    %c0_2 = arith.constant 0 : index
    %c0_3 = arith.constant 0 : index
    %4 = vector.load %arg3[%c0_2, %c0_3] : memref<80x32xbf16, #tpu.memory_space<vmem>>, vector<80x32xbf16>
    %c0_4 = arith.constant 0 : index
    %c0_5 = arith.constant 0 : index
    %5 = vector.load %arg5[%c0_4, %c0_5] : memref<64x16xbf16, #tpu.memory_space<vmem>>, vector<64x16xbf16>
    %c0_6 = arith.constant 0 : index
    %c0_7 = arith.constant 0 : index
    %6 = vector.load %arg6[%c0_6, %c0_7] : memref<16x16xf32, #tpu.memory_space<vmem>>, vector<16x16xf32>
    %c0_8 = arith.constant 0 : index
    %c0_9 = arith.constant 0 : index
    %7 = vector.load %arg7[%c0_8, %c0_9] : memref<64x64xf32, #tpu.memory_space<vmem>>, vector<64x64xf32>
    %c0_10 = arith.constant 0 : index
    %c0_11 = arith.constant 0 : index
    %8 = vector.load %arg8[%c0_10, %c0_11] : memref<16x1xf32, #tpu.memory_space<vmem>>, vector<16x1xf32>
    %c0_12 = arith.constant 0 : index
    %c0_13 = arith.constant 0 : index
    %9 = vector.load %arg9[%c0_12, %c0_13] : memref<16x1xf32, #tpu.memory_space<vmem>>, vector<16x1xf32>
    %c0_14 = arith.constant 0 : index
    %c0_15 = arith.constant 0 : index
    %10 = vector.load %arg10[%c0_14, %c0_15] : memref<16x1xf32, #tpu.memory_space<vmem>>, vector<16x1xf32>
    %c0_16 = arith.constant 0 : index
    %c0_17 = arith.constant 0 : index
    %11 = vector.load %arg11[%c0_16, %c0_17] : memref<16x1xf32, #tpu.memory_space<vmem>>, vector<16x1xf32>
    %c0_18 = arith.constant 0 : index
    %c0_19 = arith.constant 0 : index
    %12 = vector.load %arg12[%c0_18, %c0_19] : memref<64x1xf32, #tpu.memory_space<vmem>>, vector<64x1xf32>
    %c0_20 = arith.constant 0 : index
    %c0_21 = arith.constant 0 : index
    %13 = vector.load %arg13[%c0_20, %c0_21] : memref<64x1xf32, #tpu.memory_space<vmem>>, vector<64x1xf32>
    %c0_22 = arith.constant 0 : index
    %c0_23 = arith.constant 0 : index
    %14 = vector.load %arg14[%c0_22, %c0_23] : memref<64x1xf32, #tpu.memory_space<vmem>>, vector<64x1xf32>
    %c0_24 = arith.constant 0 : index
    %c0_25 = arith.constant 0 : index
    %15 = vector.load %arg15[%c0_24, %c0_25] : memref<64x1xf32, #tpu.memory_space<vmem>>, vector<64x1xf32>
    %cst = arith.constant 0.000000e+00 : bf16
    %16 = vector.broadcast %cst : bf16 to vector<48x128xbf16>
    %c0_26 = arith.constant 0 : index
    %c0_27 = arith.constant 0 : index
    %17 = vector.load %arg17[%c0_26, %c0_27] : memref<48x512xbf16, #tpu.memory_space<vmem>>, vector<48x128xbf16>
    tpu.vector_store %arg17[%c0_26, %c0_27], %16 {strides = array<i32>} : memref<48x512xbf16, #tpu.memory_space<vmem>>, vector<48x128xbf16>,
    %cst_28 = arith.constant 0.000000e+00 : bf16
    %18 = vector.broadcast %cst_28 : bf16 to vector<48x128xbf16>
    %c0_29 = arith.constant 0 : index
    %c384 = arith.constant 384 : index
    %19 = vector.load %arg17[%c0_29, %c384] : memref<48x512xbf16, #tpu.memory_space<vmem>>, vector<48x128xbf16>
    tpu.vector_store %arg17[%c0_29, %c384], %18 {strides = array<i32>} : memref<48x512xbf16, #tpu.memory_space<vmem>>, vector<48x128xbf16>,
    %c0_i32 = arith.constant 0 : i32
    %c2_i32 = arith.constant 2 : i32
    %20 = arith.addi %c0_i32, %c2_i32 : i32
    %c1_i32 = arith.constant 1 : i32
    scf.for %arg18 = %c0_i32 to %20 step %c1_i32  : i32 {
      %21 = arith.index_cast %arg18 : i32 to index
      %c0_31 = arith.constant 0 : index
      %c0_32 = arith.constant 0 : index
      %22 = vector.load %arg2[%21, %c0_31, %c0_32] : memref<2x32x256xbf16, #tpu.memory_space<vmem>>, vector<1x32x256xbf16>
      %23 = vector.shape_cast %22 : vector<1x32x256xbf16> to vector<32x256xbf16>
      %cst_33 = arith.constant dense<0.000000e+00> : vector<80x256xf32>
      %24 = tpu.matmul %4, %23, %cst_33 {dimension_numbers = #tpu.dot_dimension_numbers<[1], [0], [0], [1], [0, 0, 1, 1], [], []>} : vector<80x32xbf16>, vector<32x256xbf16>, vector<80x256xf32> -> vector<80x256xf32>
      %25 = vector.extract_strided_slice %24 {offsets = [0, 0], sizes = [16, 256], strides = [1, 1]} : vector<80x256xf32> to vector<16x256xf32>
      %cst_34 = arith.constant dense<0.000000e+00> : vector<16xf32>
      %26 = vector.multi_reduction <add>, %25, %cst_34 [1] : vector<16x256xf32> to vector<16xf32>
      %27 = vector.shape_cast %26 : vector<16xf32> to vector<16x1xf32>
      %28 = arith.mulf %25, %25 : vector<16x256xf32>
      %cst_35 = arith.constant dense<0.000000e+00> : vector<16xf32>
      %29 = vector.multi_reduction <add>, %28, %cst_35 [1] : vector<16x256xf32> to vector<16xf32>
      %30 = vector.shape_cast %29 : vector<16xf32> to vector<16x1xf32>
      %cst_36 = arith.constant dense<0.000000e+00> : vector<16x1xf32>
      %31 = tpu.matmul %6, %27, %cst_36 {dimension_numbers = #tpu.dot_dimension_numbers<[1], [0], [0], [1], [0, 0, 1, 1], [], []>} : vector<16x16xf32>, vector<16x1xf32>, vector<16x1xf32> -> vector<16x1xf32>
      %cst_37 = arith.constant dense<0.000000e+00> : vector<16x1xf32>
      %32 = tpu.matmul %6, %30, %cst_37 {dimension_numbers = #tpu.dot_dimension_numbers<[1], [0], [0], [1], [0, 0, 1, 1], [], []>} : vector<16x16xf32>, vector<16x1xf32>, vector<16x1xf32> -> vector<16x1xf32>
      %33 = arith.mulf %31, %31 : vector<16x1xf32>
      %34 = arith.subf %32, %33 : vector<16x1xf32>
      %cst_38 = arith.constant 0.000000e+00 : f32
      %35 = vector.broadcast %cst_38 : f32 to vector<16x1xf32>
      %36 = arith.maximumf %34, %35 : vector<16x1xf32>
      %cst_39 = arith.constant 9.99999974E-6 : f32
      %37 = vector.broadcast %cst_39 : f32 to vector<16x1xf32>
      %38 = arith.addf %36, %37 : vector<16x1xf32>
      %39 = math.rsqrt %38 : vector<16x1xf32>
      %40 = vector.broadcast %31 : vector<16x1xf32> to vector<16x256xf32>
      %41 = arith.subf %25, %40 : vector<16x256xf32>
      %42 = arith.mulf %39, %8 : vector<16x1xf32>
      %43 = vector.broadcast %42 : vector<16x1xf32> to vector<16x256xf32>
      %44 = arith.mulf %41, %43 : vector<16x256xf32>
      %45 = vector.broadcast %9 : vector<16x1xf32> to vector<16x256xf32>
      %46 = arith.addf %44, %45 : vector<16x256xf32>
      %cst_40 = arith.constant 0.000000e+00 : f32
      %47 = vector.broadcast %cst_40 : f32 to vector<16x256xf32>
      %48 = arith.maximumf %46, %47 : vector<16x256xf32>
      %49 = arith.truncf %48 : vector<16x256xf32> to vector<16x256xbf16>
      %c16 = arith.constant 16 : index
      %c128 = arith.constant 128 : index
      %50 = vector.load %arg17[%c16, %c128] : memref<48x512xbf16, #tpu.memory_space<vmem>>, vector<16x256xbf16>
      tpu.vector_store %arg17[%c16, %c128], %49 {strides = array<i32>} : memref<48x512xbf16, #tpu.memory_space<vmem>>, vector<16x256xbf16>,
      %c16_41 = arith.constant 16 : index
      %c127 = arith.constant 127 : index
      %51 = vector.load %arg17[%c16_41, %c127] : memref<48x512xbf16, #tpu.memory_space<vmem>>, vector<16x256xbf16>
      %52 = vector.broadcast %1 : vector<1x256xbf16> to vector<16x256xbf16>
      %53 = arith.mulf %51, %52 : vector<16x256xbf16>
      %c0_42 = arith.constant 0 : index
      %c128_43 = arith.constant 128 : index
      %54 = vector.load %arg17[%c0_42, %c128_43] : memref<48x512xbf16, #tpu.memory_space<vmem>>, vector<16x256xbf16>
      tpu.vector_store %arg17[%c0_42, %c128_43], %53 {strides = array<i32>} : memref<48x512xbf16, #tpu.memory_space<vmem>>, vector<16x256xbf16>,
      %c16_44 = arith.constant 16 : index
      %c129 = arith.constant 129 : index
      %55 = vector.load %arg17[%c16_44, %c129] : memref<48x512xbf16, #tpu.memory_space<vmem>>, vector<16x256xbf16>
      %56 = vector.broadcast %3 : vector<1x256xbf16> to vector<16x256xbf16>
      %57 = arith.mulf %55, %56 : vector<16x256xbf16>
      %c32 = arith.constant 32 : index
      %c128_45 = arith.constant 128 : index
      %58 = vector.load %arg17[%c32, %c128_45] : memref<48x512xbf16, #tpu.memory_space<vmem>>, vector<16x256xbf16>
      tpu.vector_store %arg17[%c32, %c128_45], %57 {strides = array<i32>} : memref<48x512xbf16, #tpu.memory_space<vmem>>, vector<16x256xbf16>,
      %c0_46 = arith.constant 0 : index
      %c0_47 = arith.constant 0 : index
      %c0_48 = arith.constant 0 : index
      %59 = vector.load %arg4[%c0_46, %c0_47, %c0_48] : memref<3x16x48xbf16, #tpu.memory_space<vmem>>, vector<1x16x48xbf16>
      %60 = vector.shape_cast %59 : vector<1x16x48xbf16> to vector<16x48xbf16>
      %c0_49 = arith.constant 0 : index
      %c112 = arith.constant 112 : index
      %61 = vector.load %arg17[%c0_49, %c112] : memref<48x512xbf16, #tpu.memory_space<vmem>>, vector<48x256xbf16>
      %cst_50 = arith.constant dense<0.000000e+00> : vector<16x256xf32>
      %62 = tpu.matmul %60, %61, %cst_50 {dimension_numbers = #tpu.dot_dimension_numbers<[1], [0], [0], [1], [0, 0, 1, 1], [], []>} : vector<16x48xbf16>, vector<48x256xbf16>, vector<16x256xf32> -> vector<16x256xf32>
      %c1_51 = arith.constant 1 : index
      %c0_52 = arith.constant 0 : index
      %c0_53 = arith.constant 0 : index
      %63 = vector.load %arg4[%c1_51, %c0_52, %c0_53] : memref<3x16x48xbf16, #tpu.memory_space<vmem>>, vector<1x16x48xbf16>
      %64 = vector.shape_cast %63 : vector<1x16x48xbf16> to vector<16x48xbf16>
      %c0_54 = arith.constant 0 : index
      %c128_55 = arith.constant 128 : index
      %65 = vector.load %arg17[%c0_54, %c128_55] : memref<48x512xbf16, #tpu.memory_space<vmem>>, vector<48x256xbf16>
      %cst_56 = arith.constant dense<0.000000e+00> : vector<16x256xf32>
      %66 = tpu.matmul %64, %65, %cst_56 {dimension_numbers = #tpu.dot_dimension_numbers<[1], [0], [0], [1], [0, 0, 1, 1], [], []>} : vector<16x48xbf16>, vector<48x256xbf16>, vector<16x256xf32> -> vector<16x256xf32>
      %67 = arith.addf %62, %66 : vector<16x256xf32>
      %c2 = arith.constant 2 : index
      %c0_57 = arith.constant 0 : index
      %c0_58 = arith.constant 0 : index
      %68 = vector.load %arg4[%c2, %c0_57, %c0_58] : memref<3x16x48xbf16, #tpu.memory_space<vmem>>, vector<1x16x48xbf16>
      %69 = vector.shape_cast %68 : vector<1x16x48xbf16> to vector<16x48xbf16>
      %c0_59 = arith.constant 0 : index
      %c144 = arith.constant 144 : index
      %70 = vector.load %arg17[%c0_59, %c144] : memref<48x512xbf16, #tpu.memory_space<vmem>>, vector<48x256xbf16>
      %cst_60 = arith.constant dense<0.000000e+00> : vector<16x256xf32>
      %71 = tpu.matmul %69, %70, %cst_60 {dimension_numbers = #tpu.dot_dimension_numbers<[1], [0], [0], [1], [0, 0, 1, 1], [], []>} : vector<16x48xbf16>, vector<48x256xbf16>, vector<16x256xf32> -> vector<16x256xf32>
      %72 = arith.addf %67, %71 : vector<16x256xf32>
      %cst_61 = arith.constant dense<0.000000e+00> : vector<16xf32>
      %73 = vector.multi_reduction <add>, %72, %cst_61 [1] : vector<16x256xf32> to vector<16xf32>
      %74 = vector.shape_cast %73 : vector<16xf32> to vector<16x1xf32>
      %75 = arith.mulf %72, %72 : vector<16x256xf32>
      %cst_62 = arith.constant dense<0.000000e+00> : vector<16xf32>
      %76 = vector.multi_reduction <add>, %75, %cst_62 [1] : vector<16x256xf32> to vector<16xf32>
      %77 = vector.shape_cast %76 : vector<16xf32> to vector<16x1xf32>
      %cst_63 = arith.constant dense<0.000000e+00> : vector<16x1xf32>
      %78 = tpu.matmul %6, %74, %cst_63 {dimension_numbers = #tpu.dot_dimension_numbers<[1], [0], [0], [1], [0, 0, 1, 1], [], []>} : vector<16x16xf32>, vector<16x1xf32>, vector<16x1xf32> -> vector<16x1xf32>
      %cst_64 = arith.constant dense<0.000000e+00> : vector<16x1xf32>
      %79 = tpu.matmul %6, %77, %cst_64 {dimension_numbers = #tpu.dot_dimension_numbers<[1], [0], [0], [1], [0, 0, 1, 1], [], []>} : vector<16x16xf32>, vector<16x1xf32>, vector<16x1xf32> -> vector<16x1xf32>
      %80 = arith.mulf %78, %78 : vector<16x1xf32>
      %81 = arith.subf %79, %80 : vector<16x1xf32>
      %cst_65 = arith.constant 0.000000e+00 : f32
      %82 = vector.broadcast %cst_65 : f32 to vector<16x1xf32>
      %83 = arith.maximumf %81, %82 : vector<16x1xf32>
      %cst_66 = arith.constant 9.99999974E-6 : f32
      %84 = vector.broadcast %cst_66 : f32 to vector<16x1xf32>
      %85 = arith.addf %83, %84 : vector<16x1xf32>
      %86 = math.rsqrt %85 : vector<16x1xf32>
      %87 = vector.broadcast %78 : vector<16x1xf32> to vector<16x256xf32>
      %88 = arith.subf %72, %87 : vector<16x256xf32>
      %89 = arith.mulf %86, %10 : vector<16x1xf32>
      %90 = vector.broadcast %89 : vector<16x1xf32> to vector<16x256xf32>
      %91 = arith.mulf %88, %90 : vector<16x256xf32>
      %92 = vector.broadcast %11 : vector<16x1xf32> to vector<16x256xf32>
      %93 = arith.addf %91, %92 : vector<16x256xf32>
      %cst_67 = arith.constant 0.000000e+00 : f32
      %94 = vector.broadcast %cst_67 : f32 to vector<16x256xf32>
      %95 = arith.maximumf %93, %94 : vector<16x256xf32>
      %96 = arith.truncf %95 : vector<16x256xf32> to vector<16x256xbf16>
      %cst_68 = arith.constant dense<0.000000e+00> : vector<64x256xf32>
      %97 = tpu.matmul %5, %96, %cst_68 {dimension_numbers = #tpu.dot_dimension_numbers<[1], [0], [0], [1], [0, 0, 1, 1], [], []>} : vector<64x16xbf16>, vector<16x256xbf16>, vector<64x256xf32> -> vector<64x256xf32>
      %cst_69 = arith.constant dense<0.000000e+00> : vector<64xf32>
      %98 = vector.multi_reduction <add>, %97, %cst_69 [1] : vector<64x256xf32> to vector<64xf32>
      %99 = vector.shape_cast %98 : vector<64xf32> to vector<64x1xf32>
      %100 = arith.mulf %97, %97 : vector<64x256xf32>
      %cst_70 = arith.constant dense<0.000000e+00> : vector<64xf32>
      %101 = vector.multi_reduction <add>, %100, %cst_70 [1] : vector<64x256xf32> to vector<64xf32>
      %102 = vector.shape_cast %101 : vector<64xf32> to vector<64x1xf32>
      %cst_71 = arith.constant dense<0.000000e+00> : vector<64x1xf32>
      %103 = tpu.matmul %7, %99, %cst_71 {dimension_numbers = #tpu.dot_dimension_numbers<[1], [0], [0], [1], [0, 0, 1, 1], [], []>} : vector<64x64xf32>, vector<64x1xf32>, vector<64x1xf32> -> vector<64x1xf32>
      %cst_72 = arith.constant dense<0.000000e+00> : vector<64x1xf32>
      %104 = tpu.matmul %7, %102, %cst_72 {dimension_numbers = #tpu.dot_dimension_numbers<[1], [0], [0], [1], [0, 0, 1, 1], [], []>} : vector<64x64xf32>, vector<64x1xf32>, vector<64x1xf32> -> vector<64x1xf32>
      %105 = arith.mulf %103, %103 : vector<64x1xf32>
      %106 = arith.subf %104, %105 : vector<64x1xf32>
      %cst_73 = arith.constant 0.000000e+00 : f32
      %107 = vector.broadcast %cst_73 : f32 to vector<64x1xf32>
      %108 = arith.maximumf %106, %107 : vector<64x1xf32>
      %cst_74 = arith.constant 9.99999974E-6 : f32
      %109 = vector.broadcast %cst_74 : f32 to vector<64x1xf32>
      %110 = arith.addf %108, %109 : vector<64x1xf32>
      %111 = math.rsqrt %110 : vector<64x1xf32>
      %112 = vector.broadcast %103 : vector<64x1xf32> to vector<64x256xf32>
      %113 = arith.subf %97, %112 : vector<64x256xf32>
      %114 = arith.mulf %111, %12 : vector<64x1xf32>
      %115 = vector.broadcast %114 : vector<64x1xf32> to vector<64x256xf32>
      %116 = arith.mulf %113, %115 : vector<64x256xf32>
      %117 = vector.broadcast %13 : vector<64x1xf32> to vector<64x256xf32>
      %118 = arith.addf %116, %117 : vector<64x256xf32>
      %119 = vector.extract_strided_slice %24 {offsets = [16, 0], sizes = [64, 256], strides = [1, 1]} : vector<80x256xf32> to vector<64x256xf32>
      %cst_75 = arith.constant dense<0.000000e+00> : vector<64xf32>
      %120 = vector.multi_reduction <add>, %119, %cst_75 [1] : vector<64x256xf32> to vector<64xf32>
      %121 = vector.shape_cast %120 : vector<64xf32> to vector<64x1xf32>
      %122 = arith.mulf %119, %119 : vector<64x256xf32>
      %cst_76 = arith.constant dense<0.000000e+00> : vector<64xf32>
      %123 = vector.multi_reduction <add>, %122, %cst_76 [1] : vector<64x256xf32> to vector<64xf32>
      %124 = vector.shape_cast %123 : vector<64xf32> to vector<64x1xf32>
      %cst_77 = arith.constant dense<0.000000e+00> : vector<64x1xf32>
      %125 = tpu.matmul %7, %121, %cst_77 {dimension_numbers = #tpu.dot_dimension_numbers<[1], [0], [0], [1], [0, 0, 1, 1], [], []>} : vector<64x64xf32>, vector<64x1xf32>, vector<64x1xf32> -> vector<64x1xf32>
      %cst_78 = arith.constant dense<0.000000e+00> : vector<64x1xf32>
      %126 = tpu.matmul %7, %124, %cst_78 {dimension_numbers = #tpu.dot_dimension_numbers<[1], [0], [0], [1], [0, 0, 1, 1], [], []>} : vector<64x64xf32>, vector<64x1xf32>, vector<64x1xf32> -> vector<64x1xf32>
      %127 = arith.mulf %125, %125 : vector<64x1xf32>
      %128 = arith.subf %126, %127 : vector<64x1xf32>
      %cst_79 = arith.constant 0.000000e+00 : f32
      %129 = vector.broadcast %cst_79 : f32 to vector<64x1xf32>
      %130 = arith.maximumf %128, %129 : vector<64x1xf32>
      %cst_80 = arith.constant 9.99999974E-6 : f32
      %131 = vector.broadcast %cst_80 : f32 to vector<64x1xf32>
      %132 = arith.addf %130, %131 : vector<64x1xf32>
      %133 = math.rsqrt %132 : vector<64x1xf32>
      %134 = vector.broadcast %125 : vector<64x1xf32> to vector<64x256xf32>
      %135 = arith.subf %119, %134 : vector<64x256xf32>
      %136 = arith.mulf %133, %14 : vector<64x1xf32>
      %137 = vector.broadcast %136 : vector<64x1xf32> to vector<64x256xf32>
      %138 = arith.mulf %135, %137 : vector<64x256xf32>
      %139 = vector.broadcast %15 : vector<64x1xf32> to vector<64x256xf32>
      %140 = arith.addf %138, %139 : vector<64x256xf32>
      %141 = arith.addf %118, %140 : vector<64x256xf32>
      %cst_81 = arith.constant 0.000000e+00 : f32
      %142 = vector.broadcast %cst_81 : f32 to vector<64x256xf32>
      %143 = arith.maximumf %141, %142 : vector<64x256xf32>
      %144 = arith.index_cast %arg18 : i32 to index
      %c0_82 = arith.constant 0 : index
      %c0_83 = arith.constant 0 : index
      %145 = vector.load %arg16[%144, %c0_82, %c0_83] : memref<2x64x256xf32, #tpu.memory_space<vmem>>, vector<1x64x256xf32>
      %146 = vector.shape_cast %145 : vector<1x64x256xf32> to vector<64x256xf32>
      %147 = vector.shape_cast %143 : vector<64x256xf32> to vector<1x64x256xf32>
      tpu.vector_store %arg16[%144, %c0_82, %c0_83], %147 {strides = array<i32>} : memref<2x64x256xf32, #tpu.memory_space<vmem>>, vector<1x64x256xf32>,
    }
    %c2_i32_30 = arith.constant 2 : i32
    return
  }
  func.func @transform_0(%arg0: i32) -> (i32, i32) {
    %c0_i32 = arith.constant 0 : i32
    %c0_i32_0 = arith.constant 0 : i32
    %c0_i32_1 = arith.constant 0 : i32
    return %c0_i32, %c0_i32_0 : i32, i32
  }
  func.func @transform_1(%arg0: i32) -> (i32, i32, i32) {
    %c0_i32 = arith.constant 0 : i32
    %c0_i32_0 = arith.constant 0 : i32
    %c0_i32_1 = arith.constant 0 : i32
    return %arg0, %c0_i32, %c0_i32_0 : i32, i32, i32
  }
  func.func @transform_2(%arg0: i32) -> (i32, i32) {
    %c0_i32 = arith.constant 0 : i32
    %c0_i32_0 = arith.constant 0 : i32
    %c0_i32_1 = arith.constant 0 : i32
    return %c0_i32, %c0_i32_0 : i32, i32
  }
  func.func @transform_3(%arg0: i32) -> (i32, i32, i32) {
    %c0_i32 = arith.constant 0 : i32
    %c0_i32_0 = arith.constant 0 : i32
    %c0_i32_1 = arith.constant 0 : i32
    %c0_i32_2 = arith.constant 0 : i32
    return %c0_i32, %c0_i32_0, %c0_i32_1 : i32, i32, i32
  }
  func.func @transform_4(%arg0: i32) -> (i32, i32) {
    %c0_i32 = arith.constant 0 : i32
    %c0_i32_0 = arith.constant 0 : i32
    %c0_i32_1 = arith.constant 0 : i32
    return %c0_i32, %c0_i32_0 : i32, i32
  }
  func.func @transform_5(%arg0: i32) -> (i32, i32) {
    %c0_i32 = arith.constant 0 : i32
    %c0_i32_0 = arith.constant 0 : i32
    %c0_i32_1 = arith.constant 0 : i32
    return %c0_i32, %c0_i32_0 : i32, i32
  }
  func.func @transform_6(%arg0: i32) -> (i32, i32) {
    %c0_i32 = arith.constant 0 : i32
    %c0_i32_0 = arith.constant 0 : i32
    %c0_i32_1 = arith.constant 0 : i32
    return %c0_i32, %c0_i32_0 : i32, i32
  }
  func.func @transform_7(%arg0: i32) -> (i32, i32) {
    %c0_i32 = arith.constant 0 : i32
    %c0_i32_0 = arith.constant 0 : i32
    %c0_i32_1 = arith.constant 0 : i32
    return %c0_i32, %c0_i32_0 : i32, i32
  }
  func.func @transform_8(%arg0: i32) -> (i32, i32) {
    %c0_i32 = arith.constant 0 : i32
    %c0_i32_0 = arith.constant 0 : i32
    %c0_i32_1 = arith.constant 0 : i32
    return %c0_i32, %c0_i32_0 : i32, i32
  }
  func.func @transform_9(%arg0: i32) -> (i32, i32) {
    %c0_i32 = arith.constant 0 : i32
    %c0_i32_0 = arith.constant 0 : i32
    %c0_i32_1 = arith.constant 0 : i32
    return %c0_i32, %c0_i32_0 : i32, i32
  }
  func.func @transform_10(%arg0: i32) -> (i32, i32) {
    %c0_i32 = arith.constant 0 : i32
    %c0_i32_0 = arith.constant 0 : i32
    %c0_i32_1 = arith.constant 0 : i32
    return %c0_i32, %c0_i32_0 : i32, i32
  }
  func.func @transform_11(%arg0: i32) -> (i32, i32) {
    %c0_i32 = arith.constant 0 : i32
    %c0_i32_0 = arith.constant 0 : i32
    %c0_i32_1 = arith.constant 0 : i32
    return %c0_i32, %c0_i32_0 : i32, i32
  }
  func.func @transform_12(%arg0: i32) -> (i32, i32) {
    %c0_i32 = arith.constant 0 : i32
    %c0_i32_0 = arith.constant 0 : i32
    %c0_i32_1 = arith.constant 0 : i32
    return %c0_i32, %c0_i32_0 : i32, i32
  }
  func.func @transform_13(%arg0: i32) -> (i32, i32) {
    %c0_i32 = arith.constant 0 : i32
    %c0_i32_0 = arith.constant 0 : i32
    %c0_i32_1 = arith.constant 0 : i32
    return %c0_i32, %c0_i32_0 : i32, i32
  }
  func.func @transform_14(%arg0: i32) -> (i32, i32) {
    %c0_i32 = arith.constant 0 : i32
    %c0_i32_0 = arith.constant 0 : i32
    %c0_i32_1 = arith.constant 0 : i32
    return %c0_i32, %c0_i32_0 : i32, i32
  }
  func.func @transform_15(%arg0: i32) -> (i32, i32, i32) {
    %c0_i32 = arith.constant 0 : i32
    %c0_i32_0 = arith.constant 0 : i32
    %c0_i32_1 = arith.constant 0 : i32
    return %arg0, %c0_i32, %c0_i32_0 : i32, i32, i32
  }
}

</mosaic_0001>

<bundles_post_ra>
// kernel: tpu_custom_call.1
= control target key start
LH: loop header
LB: loop body
LE: loop exit
PB: predicated region body
PF: predicated region fallthrough
CT: control target
= control target key end

     0   :  { %20 = vsyncpa [#allocation4], 0  ;;  %s4725_s0 = inlined_call_operand.vmem [shape: f32[2,256], index: 0, kind: input, shape index: {}]   ;;  %s4726_s1 = inlined_call_operand.vmem [shape: bf16[4,32,256], index: 1, kind: input, shape index: {}]   ;;  %s4727_s2 = inlined_call_operand.vmem [shape: bf16[80,32], index: 2, kind: input, shape index: {}]   ;;  %s4728_s3 = inlined_call_operand.vmem [shape: bf16[3,16,48], index: 3, kind: input, shape index: {}]   ;;  %s4729_s4 = inlined_call_operand.vmem [shape: bf16[64,16], index: 4, kind: input, shape index: {}]   ;;  %s4730_s5 = inlined_call_operand.vmem [shape: f32[16,16], index: 5, kind: input, shape index: {}]   ;;  %s4731_s6 = inlined_call_operand.vmem [shape: f32[64,64], index: 6, kind: input, shape index: {}]   ;;  %s4732_s7 = inlined_call_operand.vmem [shape: f32[16,1], index: 7, kind: input, shape index: {}]   ;;  %s4733_s8 = inlined_call_operand.vmem [shape: f32[16,1], index: 8, kind: input, shape index: {}]   ;;  %s4734_s9 = inlined_call_operand.vmem [shape: f32[16,1], index: 9, kind: input, shape index: {}]   ;;  %s4735_s10 = inlined_call_operand.vmem [shape: f32[16,1], index: 10, kind: input, shape index: {}]   ;;  %s4736_s11 = inlined_call_operand.vmem [shape: f32[64,1], index: 11, kind: input, shape index: {}]   ;;  %s4737_s12 = inlined_call_operand.vmem [shape: f32[64,1], index: 12, kind: input, shape index: {}]   ;;  %s4738_s13 = inlined_call_operand.vmem [shape: f32[64,1], index: 13, kind: input, shape index: {}]   ;;  %s4739_s14 = inlined_call_operand.vmem [shape: f32[64,1], index: 14, kind: input, shape index: {}]   ;;  %s4740_s15 = inlined_call_operand.hbm [shape: f32[4,64,256], index: 15, kind: output, shape index: {}]  }
   0x1   :  { %22 = vsyncpa [#allocation4 + $0x1], 0  ;;  %s3503_s18 = smov 0   ;;  %s3505_s19 = smov 0  }
   0x2   :  { %s3507_s20 = smov 0   ;;  %s3509_s21 = smov 0  }
   0x3 LB: > { %4802 = sst [smem:[#allocation6_spill]] %s3396_s18  ;;  %s3524_s22 = sadd.s32 4294967295, %s3408_s21   ;;  %s3408_s21 = sphi %s3509_s21, %s5028_s21   ;;  %s3404_s20 = sphi %s3507_s20, %s5033_s20   ;;  %s3400_s19 = sphi %s3505_s19, %s5032_s19   ;;  %s3396_s18 = sphi %s3503_s18, %s5031_s18  }
   0x4   : > { %4803 = sst [smem:[#allocation7_spill]] %s3404_s20  ;;  %s2824_s23 = sadd.s32 4294967294, %s3408_s21  }
   0x5   : > { %4804 = sst [smem:[#allocation8_spill]] %s3408_s21  ;;  %s3528_s24 = sadd.s32 1, %s3408_s21  }
   0x6   : > { %4805 = sst [smem:[#allocation9_spill]] %s3528_s24  ;;  %s355_s25 = sadd.s32 1, %s3404_s20 }
   0x7   : > { %s352_s26 = ssub.s32 %s3408_s21, %s3528_s24  ;;  %p365_p0 = scmp.ne.s32.totalorder %s3404_s20, %s3400_s19 }
   0x8   : > { %p353_p1 = scmp.eq.s32.totalorder %s352_s26, 0  ;;  %p366_p2 = scmp.eq.s32.totalorder %s3524_s22, 1 }
   0x9   : > { %p371_p3 = scmp.ne.s32.totalorder %s3400_s19, %s3396_s18  ;;  %p372_p4 = scmp.eq.s32.totalorder %s2824_s23, 1 }
   0xa   : > { %s3539_s27 = scalar_select %p353_p1, %s3404_s20, %s355_s25  }
   0xb   : > { %p3541_p5 = por %p366_p2, %p365_p0  ;;  %p3545_p6 = por %p372_p4, %p371_p3 }
   0xc   : > { %4806 = sst [smem:[#allocation10_spill]] %s3539_s27  ;;  %p2827_p7 = scmp.ge.s32.totalorder %s3408_s21, 1 }
   0xd   : > { %s4808_s29 = scalar_select %p3545_p6, 1, 0 }
   0xe   : > { %p442_p8 = scmp.lt.s32.totalorder %s3408_s21, 3 }
   0xf   : > { %4809 = sst [smem:[#allocation11_spill]] %s4808_s29 }
  0x10   : > { %p443_p9 = pnand %p2827_p7, %p442_p8 }
  0x12   : > { %446 = sbr.rel (%p443_p9) target bundleno = 2688 (0xa80), region = 80 }
  0x19   : > { %s4746_s30 = sand.u32 1, %s3400_s19   ;;  %s2829_s16 = sshll.u32 %s3524_s22, 1  ;;  %v502_v0 = vlaneseq  ;;  %v3556_v1 = vld [vmem:[%s4730_s5] sm:$0xff]  ;;  %v3571_v4 = vld [vmem:[%s4730_s5 + $0x8] sm:$0xff]  ;;  %v3603_v13 = vld [vmem:[%s4727_s2 + $0x10] sm:$0xf] }
  0x1a   : > { %4810 = vst [vmem:[#allocation12_spill] sm:$0xff] %v3556_v1  ;;  %s3560_s25 = sshll.u32 %s4746_s30, 8  ;;  %p492_p10 = scmp.lt.s32.totalorder %s2829_s16, 3  ;;  %v500_v2 = vld [vmem:[%s4725_s0] ss:$2 sm:$0x3] }
  0x1b   : > { %v2832_v3 = vld [vmem:[%s4725_s0 + $0x1] ss:$2 sm:$0x3]  ;;  %4811 = vst [vmem:[#allocation13_spill] sm:$0xff] %v3571_v4  ;;  %v503_v5 = vshrl.u32 %v502_v0, 7  ;;  %4818 = vst [vmem:[#allocation20_spill] sm:$0xff] %v3603_v13 }
  0x1c   : > { %v3576_v6 = vld [vmem:[%s4727_s2] sm:$0xf]  ;;  %v3581_v7 = vld [vmem:[%s4727_s2 + $0x4] sm:$0xf]  ;;  %s5035_s16 = smov (!%p492_p10, %s2829_s16), 3  ;;  %v3623_v17 = vld [vmem:[%s4731_s6 + $0x8] sm:$0xff] }
  0x1d   : > { %4812 = vst [vmem:[#allocation14_spill] sm:$0xff] %v3576_v6  ;;  %4813 = vst [vmem:[#allocation15_spill] sm:$0xff] %v3581_v7  ;;  %v3586_v8 = vld [vmem:[%s4727_s2 + $0x8] sm:$0xf]  ;;  %v3591_v9 = vld [vmem:[%s4727_s2 + $0xc] sm:$0xf] }
  0x1e   : > { %4814 = vst [vmem:[#allocation16_spill] sm:$0xff] %v3586_v8  ;;  %4815 = vst [vmem:[#allocation17_spill] sm:$0xff] %v3591_v9  ;;  %v3596_v10 = vld [vmem:[%s4731_s6] sm:$0xff]  ;;  %v3598_v11 = vsub.s32 0, %v503_v5  ;;  %v508_v12 = vsub.s32 1, %v503_v5  ;;  %s2915_s27 = sshll.u32 %s5035_s16, 5 }
  0x1f   : > { %4816 = vst [vmem:[#allocation18_spill] sm:$0xff] %v3596_v10  ;;  %v3608_v14 = vld [vmem:[%s4727_s2 + $0x14] sm:$0xf]  ;;  %v3613_v15 = vld [vmem:[%s4727_s2 + $0x18] sm:$0xf]  ;;  %4822 = vst [vmem:[#allocation24_spill] sm:$0xff] %v3623_v17  ;;  %s3628_s23 = scalar_lea.vmem %s4726_s1, %s2915_s27 }
  0x20   : > { %4817 = vst [vmem:[#allocation19_spill] sm:$0xff] %v3598_v11  ;;  %4819 = vst [vmem:[#allocation21_spill] sm:$0xff] %v3608_v14  ;;  %v3618_v16 = vld [vmem:[%s4727_s2 + $0x1c] sm:$0xf]  ;;  %v505_v18 = vrot.slane %v500_v2, %v3598_v11  ;;  %v509_v19 = vrot.slane %v500_v2, %v508_v12  ;;  %v520_v20 = vrot.slane %v2832_v3, %v3598_v11  ;;  %v3635_v22 = vld [vmem:[%s4727_s2 + $0x20] sm:$0xf] }
  0x21   : > { %4820 = vst [vmem:[#allocation22_spill] sm:$0xff] %v3613_v15  ;;  %4821 = vst [vmem:[#allocation23_spill] sm:$0xff] %v3618_v16  ;;  %v524_v21 = vrot.slane %v2832_v3, %v508_v12  ;;  %v3640_v23 = vld [vmem:[%s4727_s2 + $0x24] sm:$0xf]  ;;  %v3645_v24 = vld [vmem:[%s4729_s4] sm:$0xf] }
  0x22   : > { %4823 = vst [vmem:[#allocation25_spill] sm:$0xff] %v3635_v22  ;;  %4824 = vst [vmem:[#allocation26_spill] sm:$0xff] %v3640_v23  ;;  %v3650_v25 = vld [vmem:[%s4729_s4 + $0x4] sm:$0xf]  ;;  %v3655_v26 = vld [vmem:[%s4729_s4 + $0x8] sm:$0xf]  ;;  %v3662_v28 = vpack.c.bf16 %v505_v18, %v505_v18  ;;  %v3664_v29 = vpack.c.bf16 %v509_v19, %v509_v19  ;;  %v3666_v30 = vpack.c.bf16 %v520_v20, %v520_v20 }
  0x23   : > { %4825 = vst [vmem:[#allocation27_spill] sm:$0xff] %v3645_v24  ;;  %4826 = vst [vmem:[#allocation28_spill] sm:$0xff] %v3650_v25  ;;  %v3660_v27 = vld [vmem:[%s4729_s4 + $0xc] sm:$0xf]  ;;  %v3668_v31 = vpack.c.bf16 %v524_v21, %v524_v21  ;;  %v3673_v32 = vld [vmem:[%s4729_s4 + $0x10] sm:$0xf] }
  0x24   : > { %4827 = vst [vmem:[#allocation29_spill] sm:$0xff] %v3655_v26  ;;  %4828 = vst [vmem:[#allocation30_spill] sm:$0xff] %v3660_v27  ;;  %v3678_v33 = vld [vmem:[%s4729_s4 + $0x14] sm:$0xf]  ;;  %v3683_v34 = vld [vmem:[%s4729_s4 + $0x18] sm:$0xf] }
  0x25   : > { %4829 = vst [vmem:[#allocation31_spill] sm:$0xff] %v3662_v28  ;;  %4830 = vst [vmem:[#allocation32_spill] sm:$0xff] %v3664_v29  ;;  %v3688_v35 = vld [vmem:[%s4729_s4 + $0x1c] sm:$0xf]  ;;  %v3693_v36 = vld [vmem:[%s4731_s6 + $0x10] sm:$0xff]  ;;  %v3414_v41 = vmov 0  }
  0x26   : > { %4831 = vst [vmem:[#allocation33_spill] sm:$0xff] %v3666_v30  ;;  %4832 = vst [vmem:[#allocation34_spill] sm:$0xff] %v3668_v31  ;;  %v3698_v37 = vld [vmem:[%s4731_s6 + $0x18] sm:$0xff]  ;;  %v3703_v38 = vld [vmem:[%s4731_s6 + $0x20] sm:$0xff]  ;;  %s490_s18 = scalar_lea.vmem [#allocation3], %s3560_s25  ;;  %s3921_s24 = smov 0  }
  0x27   : > { %4833 = vst [vmem:[#allocation35_spill] sm:$0xff] %v3673_v32  ;;  %4834 = vst [vmem:[#allocation36_spill] sm:$0xff] %v3678_v33  ;;  %v3708_v39 = vld [vmem:[%s4731_s6 + $0x28] sm:$0xff]  ;;  %v3713_v40 = vld [vmem:[%s4731_s6 + $0x30] sm:$0xff] }
  0x28   : > { %4835 = vst [vmem:[#allocation37_spill] sm:$0xff] %v3683_v34  ;;  %4836 = vst [vmem:[#allocation38_spill] sm:$0xff] %v3688_v35  ;;  %v3718_v42 = vld [vmem:[%s4731_s6 + $0x38] sm:$0xff]  ;;  %v3723_v43 = vld [vmem:[%s4732_s7] sm:$0xff] }
  0x29   : > { %4837 = vst [vmem:[#allocation39_spill] sm:$0xff] %v3693_v36  ;;  %4838 = vst [vmem:[#allocation40_spill] sm:$0xff] %v3698_v37  ;;  %v3728_v44 = vld [vmem:[%s4732_s7 + $0x8] sm:$0xff]  ;;  %v3733_v45 = vld [vmem:[%s4733_s8] sm:$0xff] }
  0x2a   : > { %4839 = vst [vmem:[#allocation41_spill] sm:$0xff] %v3703_v38  ;;  %4840 = vst [vmem:[#allocation42_spill] sm:$0xff] %v3708_v39  ;;  %v3738_v46 = vld [vmem:[%s4733_s8 + $0x8] sm:$0xff]  ;;  %v3743_v47 = vld [vmem:[%s4734_s9] sm:$0xff] }
  0x2b   : > { %4841 = vst [vmem:[#allocation43_spill] sm:$0xff] %v3713_v40  ;;  %597 = vst [vmem:[#allocation2] sm:$0xff] %v3414_v41  ;;  %v3748_v48 = vld [vmem:[%s4734_s9 + $0x8] sm:$0xff]  ;;  %v3753_v49 = vld [vmem:[%s4735_s10] sm:$0xff] }
  0x2c   : > { %598 = vst [vmem:[#allocation2 + $0x20] sm:$0xff] %v3414_v41  ;;  %599 = vst [vmem:[#allocation2 + $0x40] sm:$0xff] %v3414_v41  ;;  %v3758_v50 = vld [vmem:[%s4735_s10 + $0x8] sm:$0xff]  ;;  %v3763_v51 = vld [vmem:[%s4736_s11] sm:$0xff] }
  0x2d   : > { %600 = vst [vmem:[#allocation2 + $0x18] sm:$0xff] %v3414_v41  ;;  %601 = vst [vmem:[#allocation2 + $0x38] sm:$0xff] %v3414_v41  ;;  %v3768_v52 = vld [vmem:[%s4736_s11 + $0x8] sm:$0xff]  ;;  %v3773_v53 = vld [vmem:[%s4736_s11 + $0x10] sm:$0xff] }
  0x2e   : > { %602 = vst [vmem:[#allocation2 + $0x58] sm:$0xff] %v3414_v41  ;;  %4842 = vst [vmem:[#allocation44_spill] sm:$0xff] %v3718_v42  ;;  %v3778_v54 = vld [vmem:[%s4736_s11 + $0x18] sm:$0xff]  ;;  %v3783_v55 = vld [vmem:[%s4736_s11 + $0x20] sm:$0xff] }
  0x2f   : > { %4843 = vst [vmem:[#allocation45_spill] sm:$0xff] %v3723_v43  ;;  %4844 = vst [vmem:[#allocation46_spill] sm:$0xff] %v3728_v44  ;;  %v3788_v56 = vld [vmem:[%s4736_s11 + $0x28] sm:$0xff]  ;;  %v3793_v57 = vld [vmem:[%s4736_s11 + $0x30] sm:$0xff] }
  0x30   : > { %4845 = vst [vmem:[#allocation47_spill] sm:$0xff] %v3733_v45  ;;  %4846 = vst [vmem:[#allocation48_spill] sm:$0xff] %v3738_v46  ;;  %v3798_v58 = vld [vmem:[%s4736_s11 + $0x38] sm:$0xff]  ;;  %v3803_v59 = vld [vmem:[%s4737_s12] sm:$0xff] }
  0x31   : > { %4847 = vst [vmem:[#allocation49_spill] sm:$0xff] %v3743_v47  ;;  %4848 = vst [vmem:[#allocation50_spill] sm:$0xff] %v3748_v48  ;;  %v3808_v60 = vld [vmem:[%s4737_s12 + $0x8] sm:$0xff]  ;;  %v3813_v61 = vld [vmem:[%s4737_s12 + $0x10] sm:$0xff] }
  0x32   : > { %4849 = vst [vmem:[#allocation51_spill] sm:$0xff] %v3753_v49  ;;  %4850 = vst [vmem:[#allocation52_spill] sm:$0xff] %v3758_v50  ;;  %v3818_v62 = vld [vmem:[%s4737_s12 + $0x18] sm:$0xff]  ;;  %v3823_v63 = vld [vmem:[%s4737_s12 + $0x20] sm:$0xff] }
  0x33   : > { %4851 = vst [vmem:[#allocation53_spill] sm:$0xff] %v3763_v51  ;;  %4852 = vst [vmem:[#allocation54_spill] sm:$0xff] %v3768_v52  ;;  %v3828_v0 = vld [vmem:[%s4737_s12 + $0x28] sm:$0xff]  ;;  %v3833_v2 = vld [vmem:[%s4737_s12 + $0x30] sm:$0xff] }
  0x34   : > { %4853 = vst [vmem:[#allocation55_spill] sm:$0xff] %v3773_v53  ;;  %4854 = vst [vmem:[#allocation56_spill] sm:$0xff] %v3778_v54  ;;  %v3838_v3 = vld [vmem:[%s4737_s12 + $0x38] sm:$0xff]  ;;  %v3843_v5 = vld [vmem:[%s4738_s13] sm:$0xff] }
  0x35   : > { %4855 = vst [vmem:[#allocation57_spill] sm:$0xff] %v3783_v55  ;;  %4856 = vst [vmem:[#allocation58_spill] sm:$0xff] %v3788_v56  ;;  %v3848_v12 = vld [vmem:[%s4738_s13 + $0x8] sm:$0xff]  ;;  %v3853_v18 = vld [vmem:[%s4738_s13 + $0x10] sm:$0xff] }
  0x36   : > { %4857 = vst [vmem:[#allocation59_spill] sm:$0xff] %v3793_v57  ;;  %4858 = vst [vmem:[#allocation60_spill] sm:$0xff] %v3798_v58  ;;  %v3858_v19 = vld [vmem:[%s4738_s13 + $0x18] sm:$0xff]  ;;  %v3863_v20 = vld [vmem:[%s4738_s13 + $0x20] sm:$0xff] }
  0x37   : > { %4859 = vst [vmem:[#allocation61_spill] sm:$0xff] %v3803_v59  ;;  %4860 = vst [vmem:[#allocation62_spill] sm:$0xff] %v3808_v60  ;;  %v3868_v21 = vld [vmem:[%s4738_s13 + $0x28] sm:$0xff]  ;;  %v3873_v41 = vld [vmem:[%s4738_s13 + $0x30] sm:$0xff] }
  0x38   : > { %4861 = vst [vmem:[#allocation63_spill] sm:$0xff] %v3813_v61  ;;  %4862 = vst [vmem:[#allocation64_spill] sm:$0xff] %v3818_v62  ;;  %v3898_v57 = vld [vmem:[%s4739_s14 + $0x18] sm:$0xff]  ;;  %v3903_v58 = vld [vmem:[%s4739_s14 + $0x20] sm:$0xff] }
  0x39   : > { %4863 = vst [vmem:[#allocation65_spill] sm:$0xff] %v3823_v63  ;;  %4864 = vst [vmem:[#allocation66_spill] sm:$0xff] %v3828_v0  ;;  %v3908_v55 = vld [vmem:[%s4739_s14 + $0x28] sm:$0xff]  ;;  %v3913_v56 = vld [vmem:[%s4739_s14 + $0x30] sm:$0xff] }
  0x3a   : > { %4865 = vst [vmem:[#allocation67_spill] sm:$0xff] %v3833_v2  ;;  %4866 = vst [vmem:[#allocation68_spill] sm:$0xff] %v3838_v3  ;;  %v3918_v53 = vld [vmem:[%s4739_s14 + $0x38] sm:$0xff] }
  0x3b   : > { %4867 = vst [vmem:[#allocation69_spill] sm:$0xff] %v3843_v5  ;;  %4868 = vst [vmem:[#allocation70_spill] sm:$0xff] %v3848_v12  ;;  %v3888_v5 = vld [vmem:[%s4739_s14 + $0x8] sm:$0xff]  ;;  %v3893_v12 = vld [vmem:[%s4739_s14 + $0x10] sm:$0xff] }
  0x3c   : > { %4869 = vst [vmem:[#allocation71_spill] sm:$0xff] %v3853_v18  ;;  %4870 = vst [vmem:[#allocation72_spill] sm:$0xff] %v3858_v19  ;;  %v3878_v18 = vld [vmem:[%s4738_s13 + $0x38] sm:$0xff]  ;;  %v3883_v19 = vld [vmem:[%s4739_s14] sm:$0xff] }
  0x3d   : > { %4871 = vst [vmem:[#allocation73_spill] sm:$0xff] %v3863_v20  ;;  %4872 = vst [vmem:[#allocation74_spill] sm:$0xff] %v3868_v21 }
  0x3e   : > { %4873 = vst [vmem:[#allocation75_spill] sm:$0xff] %v3873_v41  ;;  %4874 = vst [vmem:[#allocation76_spill] sm:$0xff] %v3878_v18 }
  0x3f   : > { %4875 = vst [vmem:[#allocation77_spill] sm:$0xff] %v3883_v19  ;;  %4876 = vst [vmem:[#allocation78_spill] sm:$0xff] %v3888_v5 }
  0x40   : > { %4877 = vst [vmem:[#allocation79_spill] sm:$0xff] %v3893_v12  ;;  %4878 = vst [vmem:[#allocation80_spill] sm:$0xff] %v3898_v57 }
  0x41   : > { %4879 = vst [vmem:[#allocation81_spill] sm:$0xff] %v3903_v58  ;;  %4880 = vst [vmem:[#allocation82_spill] sm:$0xff] %v3908_v55 }
  0x42   : > { %4881 = vst [vmem:[#allocation83_spill] sm:$0xff] %v3913_v56  ;;  %4882 = vst [vmem:[#allocation84_spill] sm:$0xff] %v3918_v53 }
  0x43 LB: >> { %v4883_v10 = vld [vmem:[#allocation18_spill] sm:$0xff]  ;;  %v4884_v4 = vld [vmem:[#allocation13_spill] sm:$0xff]  ;;  %v4885_v1 = vld [vmem:[#allocation12_spill] sm:$0xff]  ;;  %v4748_v54 = vmov 0   ;;  %s2916_s29 = sshll.u32 %s3412_s24, 5  ;;  %vm661_vm0 = vcmask 261120   ;;  %s3412_s24 = sphi %s3921_s24, %s608_s24  }
  0x44   : >> { %v4886_v11 = vld [vmem:[#allocation19_spill] sm:$0xff]  ;;  %709 = vmatprep.mubr.bf16.mxu0 %v4748_v54  ;;  %3292 = vset.pattern.permute.xlu1 %v4748_v54  ;;  %s611_s26 = scalar_lea.vmem %s3628_s23, %s2916_s29  ;;  %v4888_v6 = vld [vmem:[#allocation14_spill] sm:$0xff]  ;;  %vm776_vm1 = vcmask 130048   ;;  %s3416_s27 = smov 1   ;;  %v4893_v43 = vld [vmem:[#allocation45_spill] sm:$0xff]  ;;  %vm1018_vm2 = vcmask 1039360  }
  0x45   : >> { %3291 = vset.pattern.permute.xlu0 %v4748_v54  ;;  %v3293_v56 = vld [vmem:[%s611_s26 + $0x4] ss:$8 sps:$4 sm:$0xff]   ;;  %v3295_v53 = vld [vmem:[%s611_s26] ss:$8 sps:$4 sm:$0xff]   ;;  %v3296_v51 = vld [vmem:[%s611_s26 + $0x14] ss:$8 sps:$4 sm:$0xff]   ;;  %3004 = vmatprep.mubr.msk.f32.mxu1 %vm776_vm1, %v4885_v1 }
  0x46   : >> { %677 = vmatprep.subr.bf16.mxu0 %v3293_v56  ;;  %v3298_v52 = vld [vmem:[%s611_s26 + $0x10] ss:$8 sps:$4 sm:$0xff]   ;;  %v4895_v46 = vld [vmem:[#allocation48_spill] sm:$0xff]  ;;  %s3417_s21 = smov 127   ;;  %v4897_v30 = vld [vmem:[#allocation33_spill] sm:$0xff]  ;;  %vm1035_vm3 = vcmask 7168  }
  0x47   : >> { %678 = vmatpush1.bf16.msra.mxu0 %v3295_v53  ;;  %v4887_v7 = vld [vmem:[#allocation15_spill] sm:$0xff]  ;;  %v4890_v31 = vld [vmem:[#allocation34_spill] sm:$0xff]  ;;  %v4896_v29 = vld [vmem:[#allocation32_spill] sm:$0xff]  ;;  %s3418_s30 = smov 16   ;;  %s3419_s17 = smov 112   ;;  %vm1106_vm4 = vcmask 392192  }
  0x48   : >> { %679 = vmatprep.subr.bf16.mxu0 %v3296_v51  ;;  %v2835_v41 = vcombine.low %v4888_v6, %v4887_v7  ;;  %v4891_v45 = vld [vmem:[#allocation47_spill] sm:$0xff]  ;;  %v4892_v44 = vld [vmem:[#allocation46_spill] sm:$0xff]  ;;  %vm1288_vm5 = vcmask 916480   ;;  %v4898_v9 = vld [vmem:[#allocation17_spill] sm:$0xff]  ;;  %vm1746_vm6 = vcmask 523264  }
  0x49   : >> { %v4894_v28 = vld [vmem:[#allocation31_spill] sm:$0xff]  ;;  %v4899_v8 = vld [vmem:[#allocation16_spill] sm:$0xff]  ;;  %v4900_v14 = vld [vmem:[#allocation21_spill] sm:$0xff] }
  0x4a   : >> { %v4901_v13 = vld [vmem:[#allocation20_spill] sm:$0xff]  ;;  %v4902_v16 = vld [vmem:[#allocation23_spill] sm:$0xff]  ;;  %v4903_v15 = vld [vmem:[#allocation22_spill] sm:$0xff] }
  0x4b   : >> { %680 = vmatpush1.bf16.msra.mxu0 %v3298_v52  ;;  %v4904_v23 = vld [vmem:[#allocation26_spill] sm:$0xff]  ;;  %v4905_v22 = vld [vmem:[#allocation25_spill] sm:$0xff]  ;;  %v4923_v50 = vld [vmem:[#allocation52_spill] sm:$0xff] }
  0x4c   : >> { %v4921_v48 = vld [vmem:[#allocation50_spill] sm:$0xff]  ;;  %v4922_v47 = vld [vmem:[#allocation49_spill] sm:$0xff]  ;;  %v4924_v49 = vld [vmem:[#allocation51_spill] sm:$0xff] }
  0x4d   : >> { %v4925_v25 = vld [vmem:[#allocation28_spill] sm:$0xff]  ;;  %v4926_v24 = vld [vmem:[#allocation27_spill] sm:$0xff]  ;;  %v4927_v27 = vld [vmem:[#allocation30_spill] sm:$0xff] }
  0x4e   : >> { %2844 = vmatmul.mubr.msk.bf16.vlgmr.msra.gmra.mrb[0].mxu0 %vm661_vm0, %v2835_v41  ;;  %v4928_v26 = vld [vmem:[#allocation29_spill] sm:$0xff]  ;;  %v4929_v33 = vld [vmem:[#allocation36_spill] sm:$0xff]  ;;  %v4930_v32 = vld [vmem:[#allocation35_spill] sm:$0xff] }
  0x4f   : >> { %719 = vmatprep.mubr.bf16.mxu0 %v4748_v54  ;;  %v4931_v35 = vld [vmem:[#allocation38_spill] sm:$0xff]  ;;  %v4932_v34 = vld [vmem:[#allocation37_spill] sm:$0xff]  ;;  %v4937_v61 = vld [vmem:[#allocation63_spill] sm:$0xff] }
  0x50   : >> { %v4935_v59 = vld [vmem:[#allocation61_spill] sm:$0xff]  ;;  %v4936_v60 = vld [vmem:[#allocation62_spill] sm:$0xff]  ;;  %v4938_v62 = vld [vmem:[#allocation64_spill] sm:$0xff] }
  0x51   : >> { %v4939_v63 = vld [vmem:[#allocation65_spill] sm:$0xff]  ;;  %v4940_v0 = vld [vmem:[#allocation66_spill] sm:$0xff]  ;;  %v4941_v2 = vld [vmem:[#allocation67_spill] sm:$0xff] }
  0x52   : >> { %v4942_v3 = vld [vmem:[#allocation68_spill] sm:$0xff]  ;;  %v4943_v19 = vld [vmem:[#allocation77_spill] sm:$0xff]  ;;  %v4944_v5 = vld [vmem:[#allocation78_spill] sm:$0xff] }
  0x53   : >> { %v4945_v12 = vld [vmem:[#allocation79_spill] sm:$0xff]  ;;  %v4946_v57 = vld [vmem:[#allocation80_spill] sm:$0xff]  ;;  %v4947_v58 = vld [vmem:[#allocation81_spill] sm:$0xff] }
 0x121   : >> { %v3935_v18 = vpop.f32.mrb[0].mxu0 }
 0x122   : >> { %v3937_v20 = vpop.f32.mrb[1].mxu0  ;;  %v766_v56 = vmul.f32 %v3935_v18, %v3935_v18 }
 0x123   : >> { %v3941_v21 = vpop.f32.mrb[2].mxu0  ;;  %v760_v51 = vadd.f32 %v3937_v20, %v3935_v18  ;;  %v767_v52 = vmul.f32 %v3937_v20, %v3937_v20 }
 0x124   : >> { %v3947_v53 = vpop.f32.mrb[3].mxu0  ;;  %v768_v41 = vmul.f32 %v3941_v21, %v3941_v21 }
 0x125   : >> { %761 = vadd.xlane.f32.xlu0 %v760_v51  ;;  %v770_v54 = vadd.f32 %v767_v52, %v766_v56  ;;  %v763_v6 = vadd.f32 %v3947_v53, %v3941_v21  ;;  %v769_v7 = vmul.f32 %v3947_v53, %v3947_v53 }
 0x127   : >> { %771 = vadd.xlane.f32.xlu1 %v770_v54  ;;  %v773_v42 = vadd.f32 %v769_v7, %v768_v41  ;;  %v1053_v7 = vpack.i.b16 %v4890_v31, %v4890_v31 }
 0x129   : >> { %764 = vadd.xlane.f32.xlu0 %v763_v6  ;;  %v4889_v6 = vmov 0  }
 0x12b   : >> { %774 = vadd.xlane.f32.xlu1 %v773_v42 }
 0x1b2   : >> { %v762_v40 = vpop.xlane.xlu0 %761 }
 0x1b4   : >> { %v772_v39 = vpop.xlane.xlu1 %771 }
 0x1b6   : >> { %v765_v38 = vpop.xlane.xlu0 %764 }
 0x1b7   : >> { %v3140_v37 = vpack.c.bf16 %v765_v38, %v762_v40 }
 0x1b8   : >> { %v775_v51 = vpop.xlane.xlu1 %774 }
 0x1b9   : >> { %v3144_v56 = vpack.c.bf16 %v775_v51, %v772_v39  ;;  %3141 = vmatprep.subr.bf16.mxu1 %v3140_v37 }
 0x1ba   : >> { %3143 = vmatpush3.bf16.msra.mxu1 %v3140_v37  ;;  %v1058_v37 = vrot.slane %v1053_v7, %v4886_v11 }
 0x1bb   : >> { %3145 = vmatprep.subr.bf16.mxu1 %v3144_v56 }
 0x1bd   : >> { %3005 = vmatmul.mubr.msk.f32.vlgmr.msra.gmra.mrb[0].mxu1 %vm776_vm1, %v4884_v4 }
 0x1be   : >> { %3147 = vmatpush3.bf16.msra.mxu1 %v3144_v56  ;;  %3011 = vmatprep.mubr.msk.f32.mxu1 %vm776_vm1, %v4885_v1 }
 0x1c1   : >> { %3012 = vmatmul.mubr.msk.f32.vlgmr.msra.gmra.mrb[2].mxu1 %vm776_vm1, %v4884_v4 }
 0x1c2   : >> { %1142 = vmatprep.mubr.bf16.mxu1 %v4889_v6 }
 0x290   : >> { %v3006_v38 = vpop.f32.mrb[0].mxu1 }
 0x291   : >> { %950 = vperm.xlu1 %3292, %v3006_v38   ;;  %v849_v39 = vpop.f32.mrb[1].mxu1  ;;  %v934_v40 = vmul.f32 %v3006_v38, %v3006_v38 }
 0x292   : >> { %945 = vperm.xlu0 %3291, %v849_v39   ;;  %v933_v42 = vmul.f32 %v849_v39, %v849_v39 }
 0x294   : >> { %v3013_v54 = vpop.f32.mrb[2].mxu1 }
 0x295   : >> { %v936_v52 = vsub.f32 %v3013_v54, %v934_v40  ;;  %v924_v41 = vpop.f32.mrb[3].mxu1  ;;  %975 = vperm.xlu1 %3292, %v4891_v45   ;;  %v999_v40 = vpack.i.b16 %v4894_v28, %v4894_v28 }
 0x296   : >> { %v935_v51 = vsub.f32 %v924_v41, %v933_v42  ;;  %1063 = vrot.lane.b32.xlu0 %v1058_v37, %s3416_s27 }
 0x297   : >> { %v938_v56 = vmax.f32 %v936_v52, 0.0  ;;  %v1004_v37 = vrot.slane %v999_v40, %v4886_v11 }
 0x298   : >> { %v937_v36 = vmax.f32 %v935_v51, 0.0 }
 0x299   : >> { %v940_v31 = vadd.f32 1e-05, %v938_v56 }
 0x29a   : >> { %v939_v17 = vadd.f32 1e-05, %v937_v36  ;;  %v1006_v36 = vpack.i.b16 %v4896_v29, %v4896_v29 }
 0x29b   : >> { %3302 = vrsqrt.f32 %v940_v31  ;;  %v1046_v31 = vpack.i.b16 %v4897_v30, %v4897_v30  ;;  %v995_v30 = vld [vmem:[#allocation2 + $0x20] sm:$0xff] }
 0x29c   : >> { %3304 = vrsqrt.f32 %v939_v17  ;;  %v1011_v17 = vrot.slane %v1006_v36, %v4886_v11 }
 0x2a5   : >> { %v3303_v55 = vpop.eup %3302 }
 0x2a6   : >> { %v958_v7 = vmul.f32 %v3303_v55, %v4892_v44  ;;  %v3305_v38 = vpop.eup %3304  ;;  %v1051_v55 = vrot.slane %v1046_v31, %v4886_v11 }
 0x2a7   : >> { %v957_v39 = vmul.f32 %v3305_v38, %v4893_v43 }
 0x2a8   : >> { %966 = vperm.xlu1 %3292, %v958_v7  }
 0x2ac   : >> { %961 = vperm.xlu1 %3292, %v957_v39  }
 0x2b0   : >> { %980 = vperm.xlu1 %3292, %v4895_v46  }
 0x2b4   : >> { %1014 = vrot.lane.b32.xlu1 %v1004_v37, %s3417_s21 }
 0x2b8   : >> { %1016 = vrot.lane.b32.xlu1 %v1011_v17, %s3417_s21 }
 0x2bc   : >> { %1061 = vrot.lane.b32.xlu1 %v1051_v55, %s3416_s27 }
 0x310   : >> { %v951_v42 = vpop.permute.xlu1 %950 }
 0x311   : >> { %v946_v52 = vpop.permute.xlu0 %945  ;;  %v955_v38 = vsub.f32 %v3941_v21, %v951_v42  ;;  %v956_v39 = vsub.f32 %v3947_v53, %v951_v42 }
 0x312   : >> { %v953_v51 = vsub.f32 %v3935_v18, %v946_v52  ;;  %v954_v56 = vsub.f32 %v3937_v20, %v946_v52 }
 0x314   : >> { %v976_v54 = vpop.permute.xlu1 %975 }
 0x327   : >> { %v967_v41 = vpop.permute.xlu1 %966 }
 0x328   : >> { %v971_v36 = vmul.f32 %v967_v41, %v955_v38  ;;  %v972_v17 = vmul.f32 %v967_v41, %v956_v39 }
 0x32b   : >> { %v962_v7 = vpop.permute.xlu1 %961 }
 0x32c   : >> { %v969_v40 = vmul.f32 %v962_v7, %v953_v51  ;;  %v970_v37 = vmul.f32 %v962_v7, %v954_v56  ;;  %v1095_v7 = vld [vmem:[#allocation2 + $0x40] sm:$0xff] }
 0x32e   : >> { %v983_v31 = vadd.f32 %v976_v54, %v969_v40  ;;  %v984_v11 = vadd.f32 %v976_v54, %v970_v37  ;;  %v1064_v54 = vpop.permute.xlu0 %1063 }
 0x32f   : >> { %v981_v55 = vpop.permute.xlu1 %980 }
 0x330   : >> { %v985_v28 = vadd.f32 %v981_v55, %v971_v36  ;;  %v986_v29 = vadd.f32 %v981_v55, %v972_v17  ;;  %v987_v43 = vmax.f32 %v983_v31, 0.0  ;;  %v988_v44 = vmax.f32 %v984_v11, 0.0  ;;  %v1044_v11 = vld [vmem:[#allocation2 + $0x38] sm:$0xff] }
 0x331   : >> { %v1249_v17 = vld [vmem:[#allocation2 + $0x18] sm:$0xff] }
 0x332   : >> { %v989_v18 = vmax.f32 %v985_v28, 0.0  ;;  %v990_v45 = vmax.f32 %v986_v29, 0.0 }
 0x333   : >> { %v1015_v20 = vpop.permute.xlu1 %1014 }
 0x334   : >> { %v991_v52 = vpack.c.bf16 %v989_v18, %v987_v43  ;;  %v992_v46 = vpack.c.bf16 %v990_v45, %v988_v44  ;;  %v1023_v21 = vmul.bf16 %v1015_v20, %v995_v30  ;;  %v1071_v44 = vmul.bf16 %v1064_v54, %v1044_v11  ;;  %v1089_v45 = vld [vmem:[#allocation2] sm:$0xff] }
 0x336   : >> { %1029 = vrot.lane.b32.xlu1 %v1023_v21, %s3416_s27  ;;  %v3299_v21 = vld [vmem:[%s4728_s3 + $0x8] sm:$0xff]  }
 0x337   : >> { %v1017_v53 = vpop.permute.xlu1 %1016 }
 0x338   : >> { %v1019_v42 = vsel %vm1018_vm2, %v1015_v20, %v1017_v53  ;;  %v1025_v41 = vmul.bf16 %v1017_v53, %v992_v46  ;;  %v1255_v53 = vld [vmem:[#allocation2 + $0x58] sm:$0xff] }
 0x339   : >> { %v1024_v51 = vmul.bf16 %v1019_v42, %v991_v52 }
 0x33a   : >> { %1033 = vrot.lane.b32.xlu1 %v1025_v41, %s3416_s27 }
 0x33b   : >> { %v1062_v56 = vpop.permute.xlu1 %1061  ;;  %1031 = vrot.lane.b32.xlu0 %v1024_v51, %s3416_s27 }
 0x33c   : >> { %v1065_v28 = vsel %vm1035_vm3, %v1062_v56, %v1064_v54  ;;  %v1069_v29 = vmul.bf16 %v1062_v56, %v991_v52 }
 0x33d   : >> { %v1070_v43 = vmul.bf16 %v1065_v28, %v992_v46 }
 0x33f   : >> { %1075 = vrot.lane.b32.xlu0 %v1069_v29, %s3417_s21  ;;  %1077 = vrot.lane.b32.xlu1 %v1070_v43, %s3417_s21 }
 0x343   : >> { %1079 = vrot.lane.b32.xlu0 %v1071_v44, %s3417_s21  ;;  %1167 = vrot.lane.b32.xlu1 %v1089_v45, %s3418_s30 }
 0x347   : >> { %1175 = vrot.lane.b32.xlu0 %v991_v52, %s3418_s30  ;;  %1177 = vrot.lane.b32.xlu1 %v992_v46, %s3418_s30 }
 0x34b   : >> { %1173 = vrot.lane.b32.xlu0 %v995_v30, %s3418_s30  ;;  %1179 = vrot.lane.b32.xlu1 %v1095_v7, %s3418_s30 }
 0x3a8   : >> { %v1030_v38 = vpop.permute.xlu1 %1029 }
 0x3ac   : >> { %v1034_v39 = vpop.permute.xlu1 %1033 }
 0x3ad   : >> { %v1032_v40 = vpop.permute.xlu0 %1031 }
 0x3ae   : >> { %v1036_v37 = vsel %vm1035_vm3, %v1030_v38, %v1032_v40  ;;  %v1037_v36 = vsel %vm1035_vm3, %v1032_v40, %v1034_v39 }
 0x3af   : >> { %1169 = vrot.lane.b32.xlu1 %v1036_v37, %s3418_s30  ;;  %1171 = vrot.lane.b32.xlu0 %v1037_v36, %s3418_s30 }
 0x3b0   : >> { %1110 = vmatprep.subr.bf16.mxu1 %v1037_v36 }
 0x3b1   : >> { %v1076_v31 = vpop.permute.xlu0 %1075  ;;  %v1078_v55 = vpop.permute.xlu1 %1077  ;;  %1111 = vmatpush1.bf16.msra.mxu1 %v1036_v37 }
 0x3b2   : >> { %v1081_v18 = vsel %vm1018_vm2, %v1076_v31, %v1078_v55  ;;  %1112 = vmatprep.subr.bf16.mxu1 %v992_v46 }
 0x3b3   : >> { %1274 = vrot.lane.b32.xlu1 %v1249_v17, %s3419_s17  ;;  %1280 = vrot.lane.b32.xlu0 %v1044_v11, %s3419_s17 }
 0x3b5   : >> { %v1080_v30 = vpop.permute.xlu0 %1079  ;;  %1113 = vmatpush1.bf16.msra.mxu1 %v991_v52  ;;  %v1168_v42 = vpop.permute.xlu1 %1167 }
 0x3b6   : >> { %v1082_v20 = vsel %vm1018_vm2, %v1078_v55, %v1080_v30 }
 0x3b7   : >> { %1183 = vrot.lane.b32.xlu0 %v1082_v20, %s3418_s30  ;;  %1114 = vmatprep.subr.bf16.mxu1 %v1082_v20 }
 0x3b8   : >> { %1181 = vrot.lane.b32.xlu1 %v1081_v18, %s3418_s30  ;;  %s2917_s30 = sshll.u32 %s3412_s24, 7  ;;  %s608_s24 = sadd.s32 1, %s3412_s24  }
 0x3b9   : >> { %1115 = vmatpush1.bf16.msra.mxu1 %v1081_v18  ;;  %v1176_v41 = vpop.permute.xlu0 %1175  ;;  %v1178_v54 = vpop.permute.xlu1 %1177  ;;  %p605_p11 = scmp.ge.s32.totalorder %s608_s24, 2  }
 0x3ba   : >> { %v1189_v43 = vsel %vm776_vm1, %v1176_v41, %v1178_v54  ;;  %s2919_s16 = sshll.u32 (%p605_p11), %s3524_s22, 12  ;;  %s2753_s27 = sshll.u32 (%p605_p11), %s490_s18, 4  ;;  %s4680_s27 = int_to_ptr.vmem [resolvable:$true] %s2753_s27 }
 0x3bb   : >> { %1272 = vrot.lane.b32.xlu0 %v1037_v36, %s3419_s17  ;;  %s4676_s26 = scalar_lea.hbm (%p605_p11), %s4740_s15, %s2919_s16  ;;  %s5024_s21 = sand.u32 (%p605_p11), 1, %s3400_s19  }
 0x3bc   : >> { %1278 = vrot.lane.b32.xlu1 %v992_v46, %s3419_s17  ;;  %2856 = vmatmul.mubr.msk.bf16.vlgmr.msra.gmra.mrb[4].mxu1 %vm1106_vm4, %v3299_v21  ;;  %s4684_s24 = scalar_lea.sflag (%p605_p11), [#allocation4], %s5024_s21  ;;  %s3342_s23 = scalar_lea.vmem (%p605_p11), %s4680_s27, 4096 }
 0x3bd   : >> { %1233 = vmatprep.mubr.bf16.mxu1 %v4889_v6  ;;  %v1180_v51 = vpop.permute.xlu1 %1179  ;;  %v1174_v56 = vpop.permute.xlu0 %1173  ;;  %p3343_p12 = scmp.ne.s32.totalorder (%p605_p11), %s4680_s27, %s3342_s23  ;;  %s3420_s22 = smov (%p605_p11), [#allocation3]  }
 0x3be   : >> { %v1188_v45 = vsel %vm776_vm1, %v1174_v56, %v1176_v41  ;;  %v3301_v56 = vld [vmem:[%s4728_s3 + $0x10] sm:$0xff]  }
 0x3bf   : >> { %1270 = vrot.lane.b32.xlu0 %v1036_v37, %s3419_s17  ;;  %v3300_v37 = vld [vmem:[%s4728_s3] sm:$0xff]   ;;  %p3344_p13 = pnand (%p605_p11), %p3343_p12, %p3541_p5 }
 0x3c0   : >> { %1276 = vrot.lane.b32.xlu1 %v991_v52, %s3419_s17 }
 0x3c1   : > { %p3345_p0 = pneg (%p605_p11), %p3344_p13 }
 0x3c3   : >> { %1284 = vrot.lane.b32.xlu0 %v1082_v20, %s3419_s17 }
 0x3c4   : >> { %1286 = vrot.lane.b32.xlu1 %v1255_v53, %s3419_s17 }
 0x3c7   : >> { %1282 = vrot.lane.b32.xlu0 %v1081_v18, %s3419_s17  ;;  %s4607_s17 = scalar_lea.vmem %s490_s18, %s2917_s30 [#allocation3]  ;;  %s3346_s30 = sshll.u32 (%p605_p11), %s3420_s22, 4  ;;  %s3347_s30 = int_to_ptr.vmem [resolvable:$false] %s3346_s30 }
 0x3c8   : > { %p3349_p1 = scmp.lt.s32.totalorder (%p605_p11), %s4680_s27, %s3347_s30 }
 0x421   : >> { %v1172_v11 = vpop.permute.xlu0 %1171  ;;  %v1170_v28 = vpop.permute.xlu1 %1169 }
 0x422   : >> { %v1187_v29 = vsel %vm776_vm1, %v1170_v28, %v1172_v11  ;;  %v1186_v46 = vsel %vm776_vm1, %v1168_v42, %v1170_v28  ;;  %v2836_v11 = vcombine.low %v4899_v8, %v4898_v9  ;;  %v2837_v28 = vcombine.low %v4901_v13, %v4900_v14 }
 0x423   : >> { %1201 = vmatprep.subr.bf16.mxu1 %v1187_v29  ;;  %v2838_v29 = vcombine.low %v4903_v15, %v4902_v16 }
 0x424   : >> { %1202 = vmatpush1.bf16.msra.mxu1 %v1186_v46  ;;  %2845 = vmatmul.mubr.msk.bf16.gmra.mrb[4].mxu0 %vm661_vm0, %v2836_v11 }
 0x425   : >> { %v1281_v52 = vpop.permute.xlu0 %1280  ;;  %1203 = vmatprep.subr.bf16.mxu1 %v1189_v43  ;;  %v1275_v44 = vpop.permute.xlu1 %1274  ;;  %729 = vmatprep.mubr.bf16.mxu0 %v4889_v6 }
 0x428   : >> { %1204 = vmatpush1.bf16.msra.mxu1 %v1188_v45 }
 0x429   : >> { %v1184_v7 = vpop.permute.xlu0 %1183 }
 0x42a   : >> { %v1182_v38 = vpop.permute.xlu1 %1181 }
 0x42b   : >> { %v1190_v39 = vsel %vm776_vm1, %v1180_v51, %v1182_v38  ;;  %v1191_v40 = vsel %vm776_vm1, %v1182_v38, %v1184_v7 }
 0x42c   : >> { %1205 = vmatprep.subr.bf16.mxu1 %v1191_v40  ;;  %2846 = vmatmul.mubr.msk.bf16.gmra.mrb[8].mxu0 %vm661_vm0, %v2837_v28 }
 0x42d   : >> { %1206 = vmatpush1.bf16.msra.mxu1 %v1190_v39  ;;  %v1273_v36 = vpop.permute.xlu0 %1272  ;;  %739 = vmatprep.mubr.bf16.mxu0 %v4889_v6 }
 0x42e   : >> { %v1279_v17 = vpop.permute.xlu1 %1278  ;;  %v1290_v31 = vsel %vm1288_vm5, %v1273_v36, %v1275_v44 }
 0x42f   : >> { %1304 = vmatprep.subr.bf16.mxu1 %v1290_v31  ;;  %v1292_v20 = vsel %vm1288_vm5, %v1279_v17, %v1281_v52  ;;  %v2839_v31 = vcombine.low %v4905_v22, %v4904_v23 }
 0x430   : >> { %2858 = vmatmul.mubr.msk.bf16.vlgmr.msra.gmra.mrb[4].mxu1 %vm1106_vm4, %v3300_v37 }
 0x431   : >> { %v1271_v55 = vpop.permute.xlu0 %1270  ;;  %1336 = vmatprep.mubr.bf16.mxu1 %v4889_v6 }
 0x432   : >> { %v1289_v18 = vsel %vm1288_vm5, %v1271_v55, %v1273_v36  ;;  %v1277_v30 = vpop.permute.xlu1 %1276 }
 0x433   : >> { %1305 = vmatpush1.bf16.msra.mxu1 %v1289_v18  ;;  %v1291_v53 = vsel %vm1288_vm5, %v1277_v30, %v1279_v17 }
 0x434   : >> { %1306 = vmatprep.subr.bf16.mxu1 %v1292_v20  ;;  %2847 = vmatmul.mubr.msk.bf16.gmra.mrb[12].mxu0 %vm661_vm0, %v2838_v29 }
 0x435   : >> { %v1285_v21 = vpop.permute.xlu0 %1284  ;;  %749 = vmatprep.mubr.bf16.mxu0 %v4889_v6 }
 0x436   : >> { %v1287_v42 = vpop.permute.xlu1 %1286 }
 0x437   : >> { %1307 = vmatpush1.bf16.msra.mxu1 %v1291_v53  ;;  %v1294_v41 = vsel %vm1288_vm5, %v1285_v21, %v1287_v42 }
 0x438   : >> { %1308 = vmatprep.subr.bf16.mxu1 %v1294_v41 }
 0x439   : >> { %v1283_v54 = vpop.permute.xlu0 %1282 }
 0x43a   : >> { %v1293_v51 = vsel %vm1288_vm5, %v1283_v54, %v1285_v21 }
 0x43b   : >> { %1309 = vmatpush1.bf16.msra.mxu1 %v1293_v51 }
 0x43c   : >> { %2848 = vmatmul.mubr.msk.bf16.gmra.mrb[16].mxu0 %vm661_vm0, %v2839_v31 }
 0x43d   : >> { %3018 = vmatprep.mubr.msk.f32.mxu0 %vm776_vm1, %v4885_v1 }
 0x43e   : >> { %2862 = vmatmul.mubr.msk.bf16.vlgmr.msra.gmra.mrb[4].mxu1 %vm1106_vm4, %v3301_v56 }
 0x43f   : >> { %1641 = vmatprep.mubr.bf16.mxu1 %v4889_v6 }
 0x4f7   : >> { %v4064_v55 = vpop.f32.mrb[4].mxu0 }
 0x4f8   : >> { %4906 = vst [vmem:[#allocation85_spill] sm:$0xff] %v4064_v55  ;;  %v4066_v18 = vpop.f32.mrb[5].mxu0 }
 0x4f9   : >> { %4907 = vst [vmem:[#allocation86_spill] sm:$0xff] %v4066_v18  ;;  %v4068_v30 = vpop.f32.mrb[6].mxu0 }
 0x4fa   : >> { %4908 = vst [vmem:[#allocation87_spill] sm:$0xff] %v4068_v30  ;;  %v4070_v20 = vpop.f32.mrb[7].mxu0  ;;  %v2223_v31 = vmul.f32 %v4068_v30, %v4068_v30 }
 0x4fb   : >> { %4909 = vst [vmem:[#allocation88_spill] sm:$0xff] %v4070_v20 }
 0x4ff   : >> { %v4072_v21 = vpop.f32.mrb[8].mxu0 }
 0x500   : >> { %4910 = vst [vmem:[#allocation89_spill] sm:$0xff] %v4072_v21  ;;  %v4074_v53 = vpop.f32.mrb[9].mxu0 }
 0x501   : >> { %4911 = vst [vmem:[#allocation90_spill] sm:$0xff] %v4074_v53  ;;  %v4076_v42 = vpop.f32.mrb[10].mxu0 }
 0x502   : >> { %4912 = vst [vmem:[#allocation91_spill] sm:$0xff] %v4076_v42  ;;  %v4078_v41 = vpop.f32.mrb[11].mxu0 }
 0x503   : >> { %4913 = vst [vmem:[#allocation92_spill] sm:$0xff] %v4078_v41 }
 0x507   : >> { %v4080_v54 = vpop.f32.mrb[12].mxu0 }
 0x508   : >> { %4914 = vst [vmem:[#allocation93_spill] sm:$0xff] %v4080_v54  ;;  %v4082_v51 = vpop.f32.mrb[13].mxu0  ;;  %v2229_v9 = vmul.f32 %v4080_v54, %v4080_v54 }
 0x509   : >> { %4915 = vst [vmem:[#allocation94_spill] sm:$0xff] %v4082_v51  ;;  %v4084_v56 = vpop.f32.mrb[14].mxu0  ;;  %v2230_v13 = vmul.f32 %v4082_v51, %v4082_v51 }
 0x50a   : >> { %4916 = vst [vmem:[#allocation95_spill] sm:$0xff] %v4084_v56  ;;  %v4086_v11 = vpop.f32.mrb[15].mxu0 }
 0x50b   : >> { %4917 = vst [vmem:[#allocation96_spill] sm:$0xff] %v4086_v11  ;;  %v4132_v8 = vadd.f32 %v4086_v11, %v4084_v56 }
 0x50f   : >> { %v4146_v14 = vpop.f32.mrb[16].mxu0 }
 0x510   : >> { %4918 = vst [vmem:[#allocation97_spill] sm:$0xff] %v4146_v14  ;;  %v4148_v15 = vpop.f32.mrb[17].mxu0 }
 0x511   : >> { %v4039_v46 = vpop.f32.mrb[4].mxu1  ;;  %4919 = vst [vmem:[#allocation98_spill] sm:$0xff] %v4148_v15  ;;  %v4150_v16 = vpop.f32.mrb[18].mxu0  ;;  %v4156_v23 = vadd.f32 %v4148_v15, %v4146_v14 }
 0x512   : >> { %v4041_v43 = vpop.f32.mrb[5].mxu1  ;;  %v1357_v52 = vmul.f32 %v4039_v46, %v4039_v46  ;;  %4920 = vst [vmem:[#allocation99_spill] sm:$0xff] %v4150_v16  ;;  %v4152_v22 = vpop.f32.mrb[19].mxu0 }
 0x513   : >> { %v4045_v44 = vpop.f32.mrb[6].mxu1  ;;  %v1351_v45 = vadd.f32 %v4041_v43, %v4039_v46  ;;  %v1358_v7 = vmul.f32 %v4041_v43, %v4041_v43 }
 0x514   : >> { %v4051_v38 = vpop.f32.mrb[7].mxu1  ;;  %v1359_v39 = vmul.f32 %v4045_v44, %v4045_v44 }
 0x515   : >> { %1352 = vadd.xlane.f32.xlu1 %v1351_v45  ;;  %v1354_v40 = vadd.f32 %v4051_v38, %v4045_v44  ;;  %v1360_v37 = vmul.f32 %v4051_v38, %v4051_v38  ;;  %v1361_v36 = vadd.f32 %v1358_v7, %v1357_v52 }
 0x517   : >> { %1355 = vadd.xlane.f32.xlu0 %v1354_v40  ;;  %v1364_v17 = vadd.f32 %v1360_v37, %v1359_v39  ;;  %v2197_v40 = vadd.f32 %v4066_v18, %v4064_v55  ;;  %v2200_v37 = vadd.f32 %v4070_v20, %v4068_v30 }
 0x519   : >> { %1365 = vadd.xlane.f32.xlu1 %v1364_v17  ;;  %v2222_v17 = vmul.f32 %v4066_v18, %v4066_v18 }
 0x51b   : >> { %1362 = vadd.xlane.f32.xlu0 %v1361_v36  ;;  %v2221_v36 = vmul.f32 %v4064_v55, %v4064_v55 }
 0x5a2   : >> { %v1353_v28 = vpop.xlane.xlu1 %1352 }
 0x5a4   : >> { %v1356_v29 = vpop.xlane.xlu0 %1355 }
 0x5a5   : >> { %v3148_v52 = vpack.c.bf16 %v1356_v29, %v1353_v28  ;;  %v2224_v28 = vmul.f32 %v4070_v20, %v4070_v20  ;;  %v4106_v29 = vadd.f32 %v2222_v17, %v2221_v36  ;;  %v2228_v36 = vmul.f32 %v4078_v41, %v4078_v41 }
 0x5a6   : >> { %v1366_v45 = vpop.xlane.xlu1 %1365 }
 0x5a7   : >> { %3149 = vmatprep.subr.bf16.mxu0 %v3148_v52 }
 0x5a8   : >> { %3151 = vmatpush3.bf16.msra.mxu0 %v3148_v52  ;;  %v1363_v7 = vpop.xlane.xlu0 %1362  ;;  %v4108_v52 = vadd.f32 %v2224_v28, %v2223_v31  ;;  %v4128_v28 = vadd.f32 %v4082_v51, %v4080_v54 }
 0x5a9   : >> { %v3152_v39 = vpack.c.bf16 %v1366_v45, %v1363_v7  ;;  %v2203_v45 = vadd.f32 %v4074_v53, %v4072_v21  ;;  %v2206_v7 = vadd.f32 %v4078_v41, %v4076_v42 }
 0x5ab   : >> { %3019 = vmatmul.mubr.msk.f32.vlgmr.msra.gmra.mrb[20].mxu0 %vm776_vm1, %v4884_v4  ;;  %3153 = vmatprep.subr.bf16.mxu0 %v3152_v39 }
 0x5ac   : >> { %3155 = vmatpush3.bf16.msra.mxu0 %v3152_v39  ;;  %3025 = vmatprep.mubr.msk.f32.mxu0 %vm776_vm1, %v4885_v1  ;;  %v2225_v39 = vmul.f32 %v4072_v21, %v4072_v21  ;;  %v2226_v1 = vmul.f32 %v4074_v53, %v4074_v53  ;;  %v4160_v53 = vadd.f32 %v4152_v22, %v4150_v16 }
 0x5ae   : >> { %v4122_v17 = vadd.f32 %v2226_v1, %v2225_v39  ;;  %v2231_v1 = vmul.f32 %v4084_v56, %v4084_v56  ;;  %v4142_v39 = vadd.f32 %v2230_v13, %v2229_v9  ;;  %v2233_v9 = vmul.f32 %v4146_v14, %v4146_v14 }
 0x5af   : >> { %3026 = vmatmul.mubr.msk.f32.vlgmr.msra.gmra.mrb[22].mxu0 %vm776_vm1, %v4884_v4  ;;  %v2227_v4 = vmul.f32 %v4076_v42, %v4076_v42  ;;  %v2234_v13 = vmul.f32 %v4148_v15, %v4148_v15 }
 0x5b0   : >> { %3044 = vmatprep.mubr.msk.f32.mxu0 %vm1746_vm6, %v4883_v10 }
 0x5b1   : >> { %v4124_v31 = vadd.f32 %v2228_v36, %v2227_v4  ;;  %v2232_v4 = vmul.f32 %v4086_v11, %v4086_v11  ;;  %v4170_v21 = vadd.f32 %v2234_v13, %v2233_v9 }
 0x5b3   : >> { %v4144_v36 = vadd.f32 %v2232_v4, %v2231_v1  ;;  %v2235_v1 = vmul.f32 %v4150_v16, %v4150_v16  ;;  %v2236_v4 = vmul.f32 %v4152_v22, %v4152_v22 }
 0x5b5   : >> { %v4172_v41 = vadd.f32 %v2236_v4, %v2235_v1 }
 0x67e   : >> { %v3020_v42 = vpop.f32.mrb[20].mxu0 }
 0x67f   : >> { %1534 = vperm.xlu1 %3292, %v3020_v42   ;;  %v1433_v18 = vpop.f32.mrb[21].mxu0  ;;  %v1518_v55 = vmul.f32 %v3020_v42, %v3020_v42 }
 0x680   : >> { %1529 = vperm.xlu0 %3291, %v1433_v18   ;;  %v1517_v20 = vmul.f32 %v1433_v18, %v1433_v18 }
 0x682   : >> { %v3027_v14 = vpop.f32.mrb[22].mxu0 }
 0x683   : >> { %v1520_v30 = vsub.f32 %v3027_v14, %v1518_v55  ;;  %v1508_v51 = vpop.f32.mrb[23].mxu0 }
 0x684   : >> { %v1519_v15 = vsub.f32 %v1508_v51, %v1517_v20 }
 0x685   : >> { %v1522_v54 = vmax.f32 %v1520_v30, 0.0 }
 0x686   : >> { %v1521_v11 = vmax.f32 %v1519_v15, 0.0 }
 0x687   : >> { %v1524_v16 = vadd.f32 1e-05, %v1522_v54 }
 0x688   : >> { %v1523_v56 = vadd.f32 1e-05, %v1521_v11 }
 0x689   : >> { %3306 = vrsqrt.f32 %v1524_v16 }
 0x68a   : >> { %3308 = vrsqrt.f32 %v1523_v56 }
 0x693   : >> { %v3307_v9 = vpop.eup %3306 }
 0x694   : >> { %v3309_v13 = vpop.eup %3308  ;;  %v1542_v1 = vmul.f32 %v3307_v9, %v4921_v48 }
 0x695   : >> { %v1541_v4 = vmul.f32 %v3309_v13, %v4922_v47 }
 0x696   : >> { %1550 = vperm.xlu0 %3291, %v1542_v1  }
 0x697   : >> { %1545 = vperm.xlu1 %3292, %v1541_v4  }
 0x69a   : >> { %1564 = vperm.xlu0 %3291, %v4923_v50  }
 0x69b   : >> { %1559 = vperm.xlu1 %3292, %v4924_v49  }
 0x6b9   : >> { %2198 = vadd.xlane.f32.xlu0 %v2197_v40 }
 0x6bd   : >> { %2204 = vadd.xlane.f32.xlu0 %v2203_v45 }
 0x6bf   : >> { %2201 = vadd.xlane.f32.xlu1 %v2200_v37 }
 0x6c3   : >> { %2207 = vadd.xlane.f32.xlu1 %v2206_v7 }
 0x6fe   : >> { %v1535_v15 = vpop.permute.xlu1 %1534 }
 0x6ff   : >> { %v1530_v14 = vpop.permute.xlu0 %1529  ;;  %v1539_v55 = vsub.f32 %v4045_v44, %v1535_v15  ;;  %v1540_v18 = vsub.f32 %v4051_v38, %v1535_v15 }
 0x700   : >> { %v1537_v20 = vsub.f32 %v4039_v46, %v1530_v14  ;;  %v1538_v42 = vsub.f32 %v4041_v43, %v1530_v14  ;;  %v2867_v46 = vcombine.low %v4926_v24, %v4925_v25  ;;  %v2868_v43 = vcombine.low %v4928_v26, %v4927_v27 }
 0x701   : >> { %v2869_v14 = vcombine.low %v4930_v32, %v4929_v33 }
 0x715   : >> { %v1551_v16 = vpop.permute.xlu0 %1550 }
 0x716   : >> { %v1546_v30 = vpop.permute.xlu1 %1545  ;;  %v1555_v54 = vmul.f32 %v1551_v16, %v1539_v55  ;;  %v1556_v51 = vmul.f32 %v1551_v16, %v1540_v18 }
 0x717   : >> { %v1553_v56 = vmul.f32 %v1546_v30, %v1537_v20  ;;  %v1554_v11 = vmul.f32 %v1546_v30, %v1538_v42 }
 0x719   : >> { %v1565_v40 = vpop.permute.xlu0 %1564 }
 0x71a   : >> { %v1569_v45 = vadd.f32 %v1565_v40, %v1555_v54  ;;  %v1570_v37 = vadd.f32 %v1565_v40, %v1556_v51  ;;  %v1560_v7 = vpop.permute.xlu1 %1559 }
 0x71b   : >> { %v1567_v9 = vadd.f32 %v1560_v7, %v1553_v56  ;;  %v1568_v13 = vadd.f32 %v1560_v7, %v1554_v11 }
 0x71c   : >> { %v1573_v1 = vmax.f32 %v1569_v45, 0.0  ;;  %v1574_v4 = vmax.f32 %v1570_v37, 0.0 }
 0x71d   : >> { %v1571_v44 = vmax.f32 %v1567_v9, 0.0  ;;  %v1572_v47 = vmax.f32 %v1568_v13, 0.0 }
 0x71f   : >> { %v1575_v38 = vpack.c.bf16 %v1573_v1, %v1571_v44  ;;  %v1576_v15 = vpack.c.bf16 %v1574_v4, %v1572_v47  ;;  %v2870_v47 = vcombine.low %v4932_v34, %v4931_v35 }
 0x721   : >> { %1609 = vmatprep.subr.bf16.mxu1 %v1576_v15 }
 0x722   : >> { %1610 = vmatpush1.bf16.msra.mxu1 %v1575_v38 }
 0x725   : >> { %2871 = vmatmul.mubr.msk.bf16.vlgmr.msra.gmra.mrb[8].mxu1 %vm776_vm1, %v2867_v46 }
 0x726   : >> { %1651 = vmatprep.mubr.bf16.mxu1 %v4889_v6 }
 0x72d   : >> { %2872 = vmatmul.mubr.msk.bf16.gmra.mrb[12].mxu1 %vm776_vm1, %v2868_v43 }
 0x72e   : >> { %1661 = vmatprep.mubr.bf16.mxu1 %v4889_v6 }
 0x735   : >> { %2873 = vmatmul.mubr.msk.bf16.gmra.mrb[16].mxu1 %vm776_vm1, %v2869_v14 }
 0x736   : >> { %1671 = vmatprep.mubr.bf16.mxu1 %v4889_v6 }
 0x73d   : >> { %2874 = vmatmul.mubr.msk.bf16.gmra.mrb[20].mxu1 %vm776_vm1, %v2870_v47 }
 0x73e   : >> { %3100 = vmatprep.mubr.msk.f32.mxu1 %vm1746_vm6, %v4883_v10 }
 0x746   : >> { %v2199_v16 = vpop.xlane.xlu0 %2198 }
 0x74a   : >> { %v2205_v30 = vpop.xlane.xlu0 %2204 }
 0x74c   : >> { %v2202_v55 = vpop.xlane.xlu1 %2201 }
 0x74d   : >> { %v3188_v18 = vpack.c.bf16 %v2202_v55, %v2199_v16 }
 0x74f   : >> { %3189 = vmatprep.subr.bf16.mxu1 %v3188_v18 }
 0x750   : >> { %3191 = vmatpush3.bf16.msra.mxu1 %v3188_v18  ;;  %v2208_v20 = vpop.xlane.xlu1 %2207 }
 0x751   : >> { %v3192_v42 = vpack.c.bf16 %v2208_v20, %v2205_v30 }
 0x753   : >> { %3193 = vmatprep.subr.bf16.mxu1 %v3192_v42 }
 0x754   : >> { %3195 = vmatpush3.bf16.msra.mxu1 %v3192_v42 }
 0x7f8   : >> { %v4197_v54 = vpop.f32.mrb[8].mxu1 }
 0x7f9   : >> { %v4199_v51 = vpop.f32.mrb[9].mxu1  ;;  %v1706_v6 = vmul.f32 %v4197_v54, %v4197_v54 }
 0x7fa   : >> { %v4203_v56 = vpop.f32.mrb[10].mxu1  ;;  %v1682_v11 = vadd.f32 %v4199_v51, %v4197_v54  ;;  %v1707_v40 = vmul.f32 %v4199_v51, %v4199_v51 }
 0x7fb   : >> { %v4209_v45 = vpop.f32.mrb[11].mxu1  ;;  %v1708_v37 = vmul.f32 %v4203_v56, %v4203_v56 }
 0x7fc   : >> { %v1685_v7 = vadd.f32 %v4209_v45, %v4203_v56  ;;  %1683 = vadd.xlane.f32.xlu1 %v1682_v11  ;;  %v1722_v9 = vadd.f32 %v1707_v40, %v1706_v6  ;;  %v1709_v13 = vmul.f32 %v4209_v45, %v4209_v45 }
 0x7fe   : >> { %1686 = vadd.xlane.f32.xlu0 %v1685_v7  ;;  %v1725_v1 = vadd.f32 %v1709_v13, %v1708_v37 }
 0x800   : >> { %v4217_v4 = vpop.f32.mrb[12].mxu1  ;;  %1726 = vadd.xlane.f32.xlu1 %v1725_v1 }
 0x801   : >> { %v4219_v44 = vpop.f32.mrb[13].mxu1  ;;  %v1710_v38 = vmul.f32 %v4217_v4, %v4217_v4 }
 0x802   : >> { %1723 = vadd.xlane.f32.xlu0 %v1722_v9  ;;  %v4223_v15 = vpop.f32.mrb[14].mxu1  ;;  %v1688_v46 = vadd.f32 %v4219_v44, %v4217_v4  ;;  %v1711_v43 = vmul.f32 %v4219_v44, %v4219_v44 }
 0x803   : >> { %v4229_v14 = vpop.f32.mrb[15].mxu1  ;;  %v1712_v47 = vmul.f32 %v4223_v15, %v4223_v15 }
 0x804   : >> { %v1691_v16 = vadd.f32 %v4229_v14, %v4223_v15  ;;  %v1728_v55 = vadd.f32 %v1711_v43, %v1710_v38  ;;  %v1713_v18 = vmul.f32 %v4229_v14, %v4229_v14 }
 0x806   : >> { %1689 = vadd.xlane.f32.xlu0 %v1688_v46  ;;  %1692 = vadd.xlane.f32.xlu1 %v1691_v16  ;;  %v1731_v30 = vadd.f32 %v1713_v18, %v1712_v47 }
 0x808   : >> { %v4237_v20 = vpop.f32.mrb[16].mxu1 }
 0x809   : >> { %v4239_v42 = vpop.f32.mrb[17].mxu1  ;;  %v1714_v6 = vmul.f32 %v4237_v20, %v4237_v20 }
 0x80a   : >> { %1729 = vadd.xlane.f32.xlu0 %v1728_v55  ;;  %1732 = vadd.xlane.f32.xlu1 %v1731_v30  ;;  %v4243_v11 = vpop.f32.mrb[18].mxu1  ;;  %v1694_v40 = vadd.f32 %v4239_v42, %v4237_v20  ;;  %v1715_v37 = vmul.f32 %v4239_v42, %v4239_v42 }
 0x80b   : >> { %v4249_v7 = vpop.f32.mrb[19].mxu1  ;;  %v1716_v9 = vmul.f32 %v4243_v11, %v4243_v11 }
 0x80c   : >> { %v1697_v13 = vadd.f32 %v4249_v7, %v4243_v11  ;;  %v1734_v1 = vadd.f32 %v1715_v37, %v1714_v6  ;;  %v1717_v38 = vmul.f32 %v4249_v7, %v4249_v7 }
 0x80e   : >> { %1695 = vadd.xlane.f32.xlu0 %v1694_v40  ;;  %1698 = vadd.xlane.f32.xlu1 %v1697_v13  ;;  %v1737_v46 = vadd.f32 %v1717_v38, %v1716_v9 }
 0x810   : >> { %v4257_v43 = vpop.f32.mrb[20].mxu1 }
 0x811   : >> { %4933 = vst [vmem:[#allocation100_spill] sm:$0xff] %v4257_v43  ;;  %v4259_v47 = vpop.f32.mrb[21].mxu1  ;;  %v1718_v16 = vmul.f32 %v4257_v43, %v4257_v43 }
 0x812   : >> { %4934 = vst [vmem:[#allocation101_spill] sm:$0xff] %v4259_v47  ;;  %v4263_v55 = vpop.f32.mrb[22].mxu1  ;;  %v1700_v18 = vadd.f32 %v4259_v47, %v4257_v43  ;;  %v1719_v30 = vmul.f32 %v4259_v47, %v4259_v47 }
 0x813   : >> { %v4269_v6 = vpop.f32.mrb[23].mxu1  ;;  %v1720_v40 = vmul.f32 %v4263_v55, %v4263_v55 }
 0x814   : >> { %1701 = vadd.xlane.f32.xlu0 %v1700_v18  ;;  %v1703_v37 = vadd.f32 %v4269_v6, %v4263_v55  ;;  %v1740_v9 = vadd.f32 %v1719_v30, %v1718_v16  ;;  %v1721_v13 = vmul.f32 %v4269_v6, %v4269_v6 }
 0x816   : >> { %1704 = vadd.xlane.f32.xlu1 %v1703_v37  ;;  %v1743_v38 = vadd.f32 %v1721_v13, %v1720_v40 }
 0x818   : >> { %1735 = vadd.xlane.f32.xlu0 %v1734_v1 }
 0x81a   : >> { %1738 = vadd.xlane.f32.xlu1 %v1737_v46 }
 0x81c   : >> { %2210 = vadd.xlane.f32.xlu0 %v4128_v28 }
 0x81e   : >> { %2213 = vadd.xlane.f32.xlu1 %v4132_v8  ;;  %v4948_v8 = vld [vmem:[#allocation82_spill] sm:$0xff] }
 0x820   : >> { %2216 = vadd.xlane.f32.xlu0 %v4156_v23 }
 0x822   : >> { %2219 = vadd.xlane.f32.xlu1 %v4160_v53 }
 0x824   : >> { %1741 = vadd.xlane.f32.xlu0 %v1740_v9 }
 0x826   : >> { %1744 = vadd.xlane.f32.xlu1 %v1743_v38 }
 0x828   : >> { %2238 = vadd.xlane.f32.xlu0 %v4106_v29 }
 0x82a   : >> { %2241 = vadd.xlane.f32.xlu1 %v4108_v52 }
 0x82c   : >> { %2244 = vadd.xlane.f32.xlu0 %v4122_v17 }
 0x82e   : >> { %2247 = vadd.xlane.f32.xlu1 %v4124_v31 }
 0x830   : >> { %2250 = vadd.xlane.f32.xlu0 %v4142_v39 }
 0x832   : >> { %2253 = vadd.xlane.f32.xlu1 %v4144_v36 }
 0x834   : >> { %2256 = vadd.xlane.f32.xlu0 %v4170_v21 }
 0x836   : >> { %2259 = vadd.xlane.f32.xlu1 %v4172_v41 }
 0x847   : >> { %2143 = vperm.xlu1 %3292, %v4935_v59  }
 0x84a   : >> { %2148 = vperm.xlu0 %3291, %v4936_v60  }
 0x84b   : >> { %2153 = vperm.xlu1 %3292, %v4937_v61  }
 0x84e   : >> { %2158 = vperm.xlu0 %3291, %v4938_v62  }
 0x84f   : >> { %2163 = vperm.xlu1 %3292, %v4939_v63  }
 0x852   : >> { %2168 = vperm.xlu0 %3291, %v4940_v0  }
 0x853   : >> { %2173 = vperm.xlu1 %3292, %v4941_v2  }
 0x856   : >> { %2178 = vperm.xlu0 %3291, %v4942_v3  }
 0x857   : >> { %2633 = vperm.xlu1 %3292, %v4943_v19  }
 0x85a   : >> { %2638 = vperm.xlu0 %3291, %v4944_v5  }
 0x85b   : >> { %2643 = vperm.xlu1 %3292, %v4945_v12  }
 0x85e   : >> { %2648 = vperm.xlu0 %3291, %v4946_v57  }
 0x85f   : >> { %2653 = vperm.xlu1 %3292, %v4947_v58  }
 0x862   : >> { %2658 = vperm.xlu0 %3291, %v4948_v8   ;;  %v4949_v8 = vld [vmem:[#allocation24_spill] sm:$0xff] }
 0x889   : >> { %v1684_v23 = vpop.xlane.xlu1 %1683 }
 0x88b   : >> { %v1687_v21 = vpop.xlane.xlu0 %1686 }
 0x88c   : >> { %v3156_v53 = vpack.c.bf16 %v1687_v21, %v1684_v23  ;;  %v4950_v21 = vld [vmem:[#allocation39_spill] sm:$0xff] }
 0x88d   : >> { %v1727_v29 = vpop.xlane.xlu1 %1726 }
 0x88e   : >> { %3157 = vmatprep.subr.bf16.mxu0 %v3156_v53 }
 0x88f   : >> { %v1724_v41 = vpop.xlane.xlu0 %1723  ;;  %3159 = vmatpush3.bf16.msra.mxu0 %v3156_v53 }
 0x890   : >> { %v3172_v37 = vpack.c.bf16 %v1727_v29, %v1724_v41  ;;  %v4951_v41 = vld [vmem:[#allocation40_spill] sm:$0xff] }
 0x893   : >> { %v1690_v52 = vpop.xlane.xlu0 %1689  ;;  %v1693_v17 = vpop.xlane.xlu1 %1692 }
 0x894   : >> { %v3160_v31 = vpack.c.bf16 %v1693_v17, %v1690_v52 }
 0x896   : >> { %3161 = vmatprep.subr.bf16.mxu0 %v3160_v31 }
 0x897   : >> { %v1730_v28 = vpop.xlane.xlu0 %1729  ;;  %v1733_v39 = vpop.xlane.xlu1 %1732  ;;  %3163 = vmatpush3.bf16.msra.mxu0 %v3160_v31 }
 0x898   : >> { %v3176_v38 = vpack.c.bf16 %v1733_v39, %v1730_v28  ;;  %v4952_v28 = vld [vmem:[#allocation41_spill] sm:$0xff] }
 0x89b   : >> { %v1696_v36 = vpop.xlane.xlu0 %1695  ;;  %v1699_v1 = vpop.xlane.xlu1 %1698 }
 0x89c   : >> { %v3164_v46 = vpack.c.bf16 %v1699_v1, %v1696_v36  ;;  %v4953_v36 = vld [vmem:[#allocation42_spill] sm:$0xff] }
 0x89e   : >> { %3165 = vmatprep.subr.bf16.mxu0 %v3164_v46 }
 0x89f   : >> { %3167 = vmatpush3.bf16.msra.mxu0 %v3164_v46 }
 0x8a1   : >> { %v1702_v16 = vpop.xlane.xlu0 %1701 }
 0x8a3   : >> { %v1705_v18 = vpop.xlane.xlu1 %1704 }
 0x8a4   : >> { %v3168_v30 = vpack.c.bf16 %v1705_v18, %v1702_v16  ;;  %v4954_v16 = vld [vmem:[#allocation43_spill] sm:$0xff] }
 0x8a5   : >> { %v1736_v40 = vpop.xlane.xlu0 %1735 }
 0x8a6   : >> { %3169 = vmatprep.subr.bf16.mxu0 %v3168_v30 }
 0x8a7   : >> { %3171 = vmatpush3.bf16.msra.mxu0 %v3168_v30  ;;  %v1739_v9 = vpop.xlane.xlu1 %1738  ;;  %v4955_v30 = vld [vmem:[#allocation44_spill] sm:$0xff] }
 0x8a8   : >> { %3173 = vmatprep.subr.bf16.mxu0 %v3172_v37  ;;  %v3180_v17 = vpack.c.bf16 %v1739_v9, %v1736_v40 }
 0x8a9   : >> { %v2211_v13 = vpop.xlane.xlu0 %2210 }
 0x8aa   : >> { %3045 = vmatmul.mubr.msk.f32.vlgmr.msra.gmra.mrb[24].mxu0 %vm1746_vm6, %v4949_v8 }
 0x8ab   : >> { %3175 = vmatpush3.bf16.msra.mxu0 %v3172_v37  ;;  %v2214_v23 = vpop.xlane.xlu1 %2213  ;;  %3047 = vmatprep.mubr.msk.f32.mxu0 %vm1746_vm6, %v4950_v21 }
 0x8ac   : >> { %v3196_v53 = vpack.c.bf16 %v2214_v23, %v2211_v13  ;;  %3177 = vmatprep.subr.bf16.mxu0 %v3176_v38 }
 0x8ad   : >> { %v2217_v52 = vpop.xlane.xlu0 %2216 }
 0x8ae   : >> { %3197 = vmatprep.subr.bf16.mxu1 %v3196_v53  ;;  %3048 = vmatmul.mubr.msk.f32.gmra.mrb[26].mxu0 %vm1746_vm6, %v4951_v41 }
 0x8af   : >> { %3179 = vmatpush3.bf16.msra.mxu0 %v3176_v38  ;;  %3199 = vmatpush3.bf16.msra.mxu1 %v3196_v53  ;;  %v2220_v29 = vpop.xlane.xlu1 %2219 }
 0x8b0   : >> { %v3200_v31 = vpack.c.bf16 %v2220_v29, %v2217_v52  ;;  %3050 = vmatprep.mubr.msk.f32.mxu0 %vm1746_vm6, %v4952_v28  ;;  %3181 = vmatprep.subr.bf16.mxu0 %v3180_v17 }
 0x8b1   : >> { %v1742_v39 = vpop.xlane.xlu0 %1741 }
 0x8b2   : >> { %3201 = vmatprep.subr.bf16.mxu1 %v3200_v31  ;;  %3051 = vmatmul.mubr.msk.f32.gmra.mrb[28].mxu0 %vm1746_vm6, %v4953_v36 }
 0x8b3   : >> { %3183 = vmatpush3.bf16.msra.mxu0 %v3180_v17  ;;  %3203 = vmatpush3.bf16.msra.mxu1 %v3200_v31  ;;  %v1745_v1 = vpop.xlane.xlu1 %1744 }
 0x8b4   : >> { %v3184_v46 = vpack.c.bf16 %v1745_v1, %v1742_v39  ;;  %3053 = vmatprep.mubr.msk.f32.mxu0 %vm1746_vm6, %v4954_v16 }
 0x8b5   : >> { %v2239_v18 = vpop.xlane.xlu0 %2238 }
 0x8b6   : >> { %3185 = vmatprep.subr.bf16.mxu0 %v3184_v46  ;;  %3101 = vmatmul.mubr.msk.f32.vlgmr.msra.gmra.mrb[24].mxu1 %vm1746_vm6, %v4949_v8 }
 0x8b7   : >> { %3054 = vmatmul.mubr.msk.f32.gmra.mrb[30].mxu0 %vm1746_vm6, %v4955_v30  ;;  %v2242_v40 = vpop.xlane.xlu1 %2241  ;;  %3103 = vmatprep.mubr.msk.f32.mxu1 %vm1746_vm6, %v4950_v21 }
 0x8b8   : >> { %3187 = vmatpush3.bf16.msra.mxu0 %v3184_v46  ;;  %v3204_v37 = vpack.c.bf16 %v2242_v40, %v2239_v18  ;;  %3072 = vmatprep.mubr.msk.f32.mxu0 %vm1746_vm6, %v4883_v10 }
 0x8b9   : >> { %v2245_v9 = vpop.xlane.xlu0 %2244 }
 0x8ba   : >> { %3104 = vmatmul.mubr.msk.f32.gmra.mrb[26].mxu1 %vm1746_vm6, %v4951_v41  ;;  %3205 = vmatprep.subr.bf16.mxu0 %v3204_v37 }
 0x8bb   : >> { %3220 = vmatprep.subr.bf16.mxu1 %v3204_v37  ;;  %3073 = vmatmul.mubr.msk.f32.vlgmr.msra.gmra.mrb[32].mxu0 %vm1746_vm6, %v4949_v8  ;;  %v2248_v13 = vpop.xlane.xlu1 %2247 }
 0x8bc   : >> { %3207 = vmatpush3.bf16.msra.mxu0 %v3204_v37  ;;  %3224 = vmatpush3.bf16.msra.mxu1 %v3204_v37  ;;  %v3208_v38 = vpack.c.bf16 %v2248_v13, %v2245_v9 }
 0x8bd   : >> { %v2251_v23 = vpop.xlane.xlu0 %2250  ;;  %3106 = vmatprep.mubr.msk.f32.mxu1 %vm1746_vm6, %v4952_v28  ;;  %3075 = vmatprep.mubr.msk.f32.mxu0 %vm1746_vm6, %v4950_v21 }
 0x8be   : >> { %3107 = vmatmul.mubr.msk.f32.gmra.mrb[28].mxu1 %vm1746_vm6, %v4953_v36  ;;  %3209 = vmatprep.subr.bf16.mxu0 %v3208_v38 }
 0x8bf   : >> { %3221 = vmatprep.subr.bf16.mxu1 %v3208_v38  ;;  %v2254_v53 = vpop.xlane.xlu1 %2253  ;;  %3109 = vmatprep.mubr.msk.f32.mxu1 %vm1746_vm6, %v4954_v16 }
 0x8c0   : >> { %3211 = vmatpush3.bf16.msra.mxu0 %v3208_v38  ;;  %3225 = vmatpush3.bf16.msra.mxu1 %v3208_v38  ;;  %v3212_v52 = vpack.c.bf16 %v2254_v53, %v2251_v23 }
 0x8c1   : >> { %3076 = vmatmul.mubr.msk.f32.gmra.mrb[34].mxu0 %vm1746_vm6, %v4951_v41  ;;  %v2257_v17 = vpop.xlane.xlu0 %2256 }
 0x8c2   : >> { %3110 = vmatmul.mubr.msk.f32.gmra.mrb[30].mxu1 %vm1746_vm6, %v4955_v30  ;;  %3213 = vmatprep.subr.bf16.mxu0 %v3212_v52 }
 0x8c3   : >> { %3222 = vmatprep.subr.bf16.mxu1 %v3212_v52  ;;  %v2260_v29 = vpop.xlane.xlu1 %2259  ;;  %3134 = vmatprep.mubr.msk.f32.mxu1 %vm1746_vm6, %v4952_v28 }
 0x8c4   : >> { %3215 = vmatpush3.bf16.msra.mxu0 %v3212_v52  ;;  %3226 = vmatpush3.bf16.msra.mxu1 %v3212_v52  ;;  %v3216_v31 = vpack.c.bf16 %v2260_v29, %v2257_v17 }
 0x8c5   : >> { %3078 = vmatprep.mubr.msk.f32.mxu0 %vm1746_vm6, %v4952_v28 }
 0x8c6   : >> { %3217 = vmatprep.subr.bf16.mxu0 %v3216_v31  ;;  %3223 = vmatprep.subr.bf16.mxu1 %v3216_v31 }
 0x8c7   : >> { %3079 = vmatmul.mubr.msk.f32.gmra.mrb[36].mxu0 %vm1746_vm6, %v4953_v36 }
 0x8c8   : >> { %3219 = vmatpush3.bf16.msra.mxu0 %v3216_v31  ;;  %3227 = vmatpush3.bf16.msra.mxu1 %v3216_v31 }
 0x8c9   : >> { %3081 = vmatprep.mubr.msk.f32.mxu0 %vm1746_vm6, %v4954_v16 }
 0x8cb   : >> { %3135 = vmatmul.mubr.msk.f32.vlgmr.msra.gmra.mrb[32].mxu1 %vm1746_vm6, %v4953_v36  ;;  %3082 = vmatmul.mubr.msk.f32.gmra.mrb[38].mxu0 %vm1746_vm6, %v4955_v30 }
 0x8cc   : >> { %3137 = vmatprep.mubr.msk.f32.mxu1 %vm1746_vm6, %v4954_v16  ;;  %3128 = vmatprep.mubr.msk.f32.mxu0 %vm1746_vm6, %v4883_v10 }
 0x8cf   : >> { %3138 = vmatmul.mubr.msk.f32.gmra.mrb[34].mxu1 %vm1746_vm6, %v4955_v30  ;;  %3129 = vmatmul.mubr.msk.f32.vlgmr.msra.gmra.mrb[40].mxu0 %vm1746_vm6, %v4949_v8 }
 0x8d0   : >> { %3131 = vmatprep.mubr.msk.f32.mxu0 %vm1746_vm6, %v4950_v21 }
 0x8d3   : >> { %3132 = vmatmul.mubr.msk.f32.gmra.mrb[42].mxu0 %vm1746_vm6, %v4951_v41 }
 0x97d   : >> { %v4367_v39 = vpop.f32.mrb[24].mxu0 }
 0x97e   : >> { %v4369_v1 = vpop.f32.mrb[25].mxu0  ;;  %v4383_v23 = vmul.f32 %v4367_v39, %v4367_v39 }
 0x97f   : >> { %v4389_v52 = vmul.f32 %v4369_v1, %v4369_v1 }
 0x981   : >> { %v4371_v46 = vpop.f32.mrb[26].mxu0 }
 0x982   : >> { %v4373_v18 = vpop.f32.mrb[27].mxu0  ;;  %v4401_v8 = vmul.f32 %v4371_v46, %v4371_v46 }
 0x983   : >> { %v4405_v12 = vmul.f32 %v4373_v18, %v4373_v18 }
 0x985   : >> { %v4375_v40 = vpop.f32.mrb[28].mxu0 }
 0x986   : >> { %v4377_v37 = vpop.f32.mrb[29].mxu0  ;;  %v4417_v25 = vmul.f32 %v4375_v40, %v4375_v40 }
 0x987   : >> { %v4421_v26 = vmul.f32 %v4377_v37, %v4377_v37 }
 0x989   : >> { %v3102_v9 = vpop.f32.mrb[24].mxu1 }
 0x98a   : >> { %2518 = vperm.xlu0 %3291, %v3102_v9   ;;  %v2327_v13 = vpop.f32.mrb[25].mxu1  ;;  %v4379_v38 = vpop.f32.mrb[30].mxu0  ;;  %v4447_v58 = vmul.f32 %v3102_v9, %v3102_v9 }
 0x98b   : >> { %2513 = vperm.xlu1 %3292, %v2327_v13   ;;  %v4385_v53 = vpop.f32.mrb[31].mxu0  ;;  %v4427_v19 = vmul.f32 %v4379_v38, %v4379_v38 }
 0x98c   : >> { %v4435_v24 = vmul.f32 %v4385_v53, %v4385_v53 }
 0x98d   : >> { %v3105_v17 = vpop.f32.mrb[26].mxu1 }
 0x98e   : >> { %2528 = vperm.xlu0 %3291, %v3105_v17   ;;  %v2337_v29 = vpop.f32.mrb[27].mxu1  ;;  %v4391_v31 = vpop.f32.mrb[32].mxu0 }
 0x98f   : >> { %2523 = vperm.xlu1 %3292, %v2337_v29   ;;  %v4395_v2 = vpop.f32.mrb[33].mxu0 }
 0x991   : >> { %v3108_v5 = vpop.f32.mrb[28].mxu1 }
 0x992   : >> { %2538 = vperm.xlu0 %3291, %v3108_v5   ;;  %v2347_v10 = vpop.f32.mrb[29].mxu1  ;;  %v2476_v33 = vmul.f32 %v3108_v5, %v3108_v5  ;;  %v4449_v5 = vmul.f32 %v2327_v13, %v2327_v13 }
 0x993   : >> { %2533 = vperm.xlu1 %3292, %v2347_v10   ;;  %v2475_v34 = vmul.f32 %v2347_v10, %v2347_v10 }
 0x994   : >> { %v4407_v16 = vpop.f32.mrb[34].mxu0 }
 0x995   : >> { %v3111_v0 = vpop.f32.mrb[30].mxu1  ;;  %v4411_v21 = vpop.f32.mrb[35].mxu0 }
 0x996   : >> { %2548 = vperm.xlu0 %3291, %v3111_v0   ;;  %v2357_v3 = vpop.f32.mrb[31].mxu1  ;;  %v2478_v59 = vmul.f32 %v3111_v0, %v3111_v0  ;;  %v2474_v0 = vmul.f32 %v3105_v17, %v3105_v17  ;;  %v4958_v17 = vsub.f32 %v4391_v31, %v4383_v23  ;;  %v4963_v23 = vsub.f32 %v4411_v21, %v4405_v12 }
 0x997   : >> { %2543 = vperm.xlu1 %3292, %v2357_v3   ;;  %v2477_v10 = vmul.f32 %v2357_v3, %v2357_v3  ;;  %v2473_v3 = vmul.f32 %v2337_v29, %v2337_v29 }
 0x998   : >> { %v1999_v31 = vmax.f32 %v4963_v23, 0.0  ;;  %v4975_v23 = vld [vmem:[#allocation70_spill] sm:$0xff] }
 0x99a   : >> { %v4423_v27 = vpop.f32.mrb[36].mxu0 }
 0x99b   : >> { %v4431_v30 = vpop.f32.mrb[37].mxu0 }
 0x99e   : >> { %v3136_v35 = vpop.f32.mrb[32].mxu1  ;;  %v4439_v36 = vpop.f32.mrb[38].mxu0 }
 0x99f   : >> { %v2484_v41 = vsub.f32 %v3136_v35, %v2476_v33  ;;  %v2452_v48 = vpop.f32.mrb[33].mxu1  ;;  %v1996_v49 = vsub.f32 %v4439_v36, %v4427_v19  ;;  %v4443_v28 = vpop.f32.mrb[39].mxu0 }
 0x9a0   : >> { %v2483_v50 = vsub.f32 %v2452_v48, %v2475_v34 }
 0x9a1   : >> { %v2492_v32 = vmax.f32 %v2484_v41, 0.0  ;;  %v2004_v21 = vmax.f32 %v1996_v49, 0.0 }
 0x9a2   : >> { %v2491_v60 = vmax.f32 %v2483_v50, 0.0  ;;  %v3139_v61 = vpop.f32.mrb[34].mxu1  ;;  %v3130_v33 = vpop.f32.mrb[40].mxu0 }
 0x9a3   : >> { %v2500_v35 = vadd.f32 1e-05, %v2492_v32  ;;  %v2486_v62 = vsub.f32 %v3139_v61, %v2478_v59  ;;  %v2462_v63 = vpop.f32.mrb[35].mxu1  ;;  %v2480_v19 = vsub.f32 %v3130_v33, %v4447_v58  ;;  %v2432_v36 = vpop.f32.mrb[41].mxu0  ;;  %v1998_v33 = vmax.f32 %v4958_v17, 0.0  ;;  %v4970_v17 = vld [vmem:[#allocation55_spill] sm:$0xff] }
 0x9a4   : >> { %v2499_v34 = vadd.f32 1e-05, %v2491_v60  ;;  %v2485_v48 = vsub.f32 %v2462_v63, %v2477_v10  ;;  %v2479_v57 = vsub.f32 %v2432_v36, %v4449_v5  ;;  %v4956_v60 = vld [vmem:[#allocation74_spill] sm:$0xff]  ;;  %v4957_v10 = vld [vmem:[#allocation73_spill] sm:$0xff] }
 0x9a5   : >> { %3310 = vrsqrt.f32 %v2500_v35  ;;  %v2494_v9 = vmax.f32 %v2486_v62, 0.0  ;;  %v4959_v35 = vld [vmem:[#allocation76_spill] sm:$0xff] }
 0x9a6   : >> { %3312 = vrsqrt.f32 %v2499_v34  ;;  %v2493_v41 = vmax.f32 %v2485_v48, 0.0  ;;  %v3133_v13 = vpop.f32.mrb[42].mxu0  ;;  %v4961_v34 = vld [vmem:[#allocation75_spill] sm:$0xff] }
 0x9a7   : >> { %v2502_v50 = vadd.f32 1e-05, %v2494_v9  ;;  %v2442_v47 = vpop.f32.mrb[43].mxu0  ;;  %v2482_v32 = vsub.f32 %v3133_v13, %v2474_v0  ;;  %v2006_v9 = vadd.f32 1e-05, %v1998_v33  ;;  %v4962_v0 = vsub.f32 %v4407_v16, %v4401_v8 }
 0x9a8   : >> { %v2501_v43 = vadd.f32 1e-05, %v2493_v41  ;;  %v2481_v59 = vsub.f32 %v2442_v47, %v2473_v3  ;;  %v4960_v47 = vsub.f32 %v4395_v2, %v4389_v52  ;;  %v4964_v2 = vsub.f32 %v4423_v27, %v4417_v25 }
 0x9a9   : >> { %3314 = vrsqrt.f32 %v2502_v50  ;;  %v2000_v41 = vmax.f32 %v4962_v0, 0.0  ;;  %v2007_v50 = vadd.f32 1e-05, %v1999_v31  ;;  %v4965_v8 = vsub.f32 %v4431_v30, %v4421_v26  ;;  %v4974_v0 = vld [vmem:[#allocation59_spill] sm:$0xff] }
 0x9aa   : >> { %3316 = vrsqrt.f32 %v2501_v43  ;;  %v1997_v43 = vmax.f32 %v4960_v47, 0.0  ;;  %v2002_v52 = vmax.f32 %v4964_v2, 0.0  ;;  %v4966_v25 = vsub.f32 %v4443_v28, %v4435_v24  ;;  %v4967_v24 = vld [vmem:[#allocation54_spill] sm:$0xff]  ;;  %v4976_v2 = vld [vmem:[#allocation69_spill] sm:$0xff] }
 0x9ab   : >> { %3318 = vrsqrt.f32 %v2006_v9  ;;  %v2008_v3 = vadd.f32 1e-05, %v2000_v41  ;;  %v2001_v16 = vmax.f32 %v4965_v8, 0.0  ;;  %v2487_v30 = vmax.f32 %v2479_v57, 0.0  ;;  %v4977_v8 = vld [vmem:[#allocation72_spill] sm:$0xff] }
 0x9ac   : >> { %v2005_v13 = vadd.f32 1e-05, %v1997_v43  ;;  %v2010_v12 = vadd.f32 1e-05, %v2002_v52  ;;  %v2003_v27 = vmax.f32 %v4966_v25, 0.0  ;;  %v4980_v25 = vld [vmem:[#allocation83_spill] sm:$0xff] }
 0x9ae   : >> { %3320 = vrsqrt.f32 %v2005_v13  ;;  %v2011_v26 = vadd.f32 1e-05, %v2003_v27  ;;  %v4500_v27 = vpop.permute.xlu0 %2148 }
 0x9af   : >> { %v3311_v58 = vpop.eup %3310  ;;  %3322 = vrsqrt.f32 %v2008_v3 }
 0x9b0   : >> { %v3313_v61 = vpop.eup %3312  ;;  %v2572_v63 = vmul.f32 %v3311_v58, %v4956_v60  ;;  %3324 = vrsqrt.f32 %v2007_v50  ;;  %v2488_v58 = vmax.f32 %v2480_v19, 0.0  ;;  %v2489_v60 = vmax.f32 %v2481_v59, 0.0  ;;  %v4971_v59 = vld [vmem:[#allocation58_spill] sm:$0xff] }
 0x9b1   : >> { %v2571_v5 = vmul.f32 %v3313_v61, %v4957_v10  ;;  %3326 = vrsqrt.f32 %v2010_v12  ;;  %v2490_v61 = vmax.f32 %v2482_v32, 0.0  ;;  %v4978_v12 = vld [vmem:[#allocation71_spill] sm:$0xff] }
 0x9b2   : >> { %2602 = vperm.xlu0 %3291, %v2572_v63   ;;  %v4968_v63 = vld [vmem:[#allocation53_spill] sm:$0xff] }
 0x9b3   : >> { %v3315_v62 = vpop.eup %3314  ;;  %2597 = vperm.xlu1 %3292, %v2571_v5   ;;  %v2498_v57 = vadd.f32 1e-05, %v2490_v61  ;;  %v4969_v5 = vld [vmem:[#allocation56_spill] sm:$0xff] }
 0x9b4   : >> { %v3317_v29 = vpop.eup %3316  ;;  %v2574_v36 = vmul.f32 %v3315_v62, %v4959_v35  ;;  %v2497_v62 = vadd.f32 1e-05, %v2489_v60 }
 0x9b5   : >> { %v2573_v48 = vmul.f32 %v3317_v29, %v4961_v34  ;;  %v4973_v34 = vld [vmem:[#allocation60_spill] sm:$0xff] }
 0x9b6   : >> { %2612 = vperm.xlu0 %3291, %v2574_v36   ;;  %v4972_v36 = vld [vmem:[#allocation57_spill] sm:$0xff] }
 0x9b7   : >> { %2607 = vperm.xlu1 %3292, %v2573_v48  }
 0x9ba   : >> { %2023 = vperm.xlu0 %3291, %v4369_v1   ;;  %v2009_v1 = vadd.f32 1e-05, %v2001_v16 }
 0x9bb   : >> { %2028 = vperm.xlu1 %3292, %v4367_v39   ;;  %v2012_v39 = vadd.f32 1e-05, %v2004_v21 }
 0x9bc   : >> { %3328 = vrsqrt.f32 %v2009_v1  ;;  %v4979_v1 = vld [vmem:[#allocation84_spill] sm:$0xff] }
 0x9bd   : >> { %3330 = vrsqrt.f32 %v2012_v39  ;;  %v4502_v39 = vpop.permute.xlu1 %2143 }
 0x9be   : >> { %2038 = vperm.xlu0 %3291, %v4371_v46   ;;  %v3319_v46 = vpop.eup %3318  ;;  %3332 = vrsqrt.f32 %v2011_v26 }
 0x9bf   : >> { %2033 = vperm.xlu1 %3292, %v4373_v18   ;;  %v3321_v49 = vpop.eup %3320  ;;  %v2496_v18 = vadd.f32 1e-05, %v2488_v58  ;;  %v2078_v28 = vmul.f32 %v3319_v46, %v4967_v24  ;;  %v4504_v58 = vpop.permute.xlu0 %2158 }
 0x9c0   : >> { %v3323_v19 = vpop.eup %3322 }
 0x9c1   : >> { %v3325_v10 = vpop.eup %3324  ;;  %3334 = vrsqrt.f32 %v2496_v18  ;;  %v4506_v26 = vpop.permute.xlu1 %2153 }
 0x9c2   : >> { %2048 = vperm.xlu0 %3291, %v4375_v40   ;;  %v2495_v40 = vadd.f32 1e-05, %v2487_v30  ;;  %v3327_v32 = vpop.eup %3326 }
 0x9c3   : >> { %2043 = vperm.xlu1 %3292, %v4377_v37   ;;  %v2077_v37 = vmul.f32 %v3321_v49, %v4968_v63  ;;  %v2082_v29 = vmul.f32 %v3327_v32, %v4971_v59  ;;  %v4508_v30 = vpop.permute.xlu0 %2168 }
 0x9c4   : >> { %3336 = vrsqrt.f32 %v2495_v40 }
 0x9c5   : >> { %3338 = vrsqrt.f32 %v2498_v57  ;;  %v4510_v46 = vpop.permute.xlu1 %2163 }
 0x9c6   : >> { %2058 = vperm.xlu0 %3291, %v4379_v38   ;;  %v2080_v38 = vmul.f32 %v3323_v19, %v4969_v5  ;;  %v3329_v33 = vpop.eup %3328  ;;  %3340 = vrsqrt.f32 %v2497_v62 }
 0x9c7   : >> { %2053 = vperm.xlu1 %3292, %v4385_v53   ;;  %v2079_v53 = vmul.f32 %v3325_v10, %v4970_v17  ;;  %v3331_v35 = vpop.eup %3330  ;;  %v2081_v47 = vmul.f32 %v3329_v33, %v4972_v36  ;;  %v4512_v49 = vpop.permute.xlu0 %2178 }
 0x9c8   : >> { %v3333_v43 = vpop.eup %3332  ;;  %v2084_v48 = vmul.f32 %v3331_v35, %v4973_v34  ;;  %4981 = vst [vmem:[#allocation102_spill] sm:$0xff] %v4512_v49 }
 0x9c9   : >> { %v2083_v41 = vmul.f32 %v3333_v43, %v4974_v0  ;;  %v4514_v18 = vpop.permute.xlu1 %2173 }
 0x9ca   : >> { %2092 = vperm.xlu0 %3291, %v2078_v28   ;;  %4982 = vst [vmem:[#allocation103_spill] sm:$0xff] %v4514_v18  ;;  %v5001_v18 = vld [vmem:[#allocation97_spill] sm:$0xff] }
 0x9cb   : >> { %2087 = vperm.xlu1 %3292, %v2077_v37   ;;  %v3335_v9 = vpop.eup %3334  ;;  %v4516_v61 = vpop.permute.xlu0 %2638 }
 0x9cc   : >> { %v2568_v31 = vmul.f32 %v3335_v9, %v4975_v23  ;;  %4983 = vst [vmem:[#allocation104_spill] sm:$0xff] %v4516_v61  ;;  %v4988_v9 = vld [vmem:[#allocation95_spill] sm:$0xff]  ;;  %v4990_v23 = vld [vmem:[#allocation93_spill] sm:$0xff]  ;;  %v5002_v61 = vld [vmem:[#allocation98_spill] sm:$0xff] }
 0x9cd   : >> { %v4518_v24 = vpop.permute.xlu1 %2633 }
 0x9ce   : >> { %2102 = vperm.xlu0 %3291, %v2080_v38   ;;  %v3337_v13 = vpop.eup %3336  ;;  %4984 = vst [vmem:[#allocation105_spill] sm:$0xff] %v4518_v24 }
 0x9cf   : >> { %2097 = vperm.xlu1 %3292, %v2079_v53   ;;  %v3339_v3 = vpop.eup %3338  ;;  %v2567_v52 = vmul.f32 %v3337_v13, %v4976_v2  ;;  %v4520_v28 = vpop.permute.xlu0 %2648 }
 0x9d0   : >> { %v3341_v50 = vpop.eup %3340  ;;  %v2570_v16 = vmul.f32 %v3339_v3, %v4977_v8  ;;  %4985 = vst [vmem:[#allocation106_spill] sm:$0xff] %v4520_v28  ;;  %v4991_v3 = vld [vmem:[#allocation94_spill] sm:$0xff] }
 0x9d1   : >> { %v2569_v21 = vmul.f32 %v3341_v50, %v4978_v12  ;;  %v4522_v40 = vpop.permute.xlu1 %2643 }
 0x9d2   : >> { %2112 = vperm.xlu0 %3291, %v2082_v29   ;;  %4986 = vst [vmem:[#allocation107_spill] sm:$0xff] %v4522_v40 }
 0x9d3   : >> { %2107 = vperm.xlu1 %3292, %v2081_v47   ;;  %v2659_v60 = vpop.permute.xlu0 %2658 }
 0x9d5   : >> { %v2654_v19 = vpop.permute.xlu1 %2653 }
 0x9d6   : >> { %2122 = vperm.xlu0 %3291, %v2084_v48  }
 0x9d7   : >> { %2117 = vperm.xlu1 %3292, %v2083_v41   ;;  %v4989_v41 = vld [vmem:[#allocation96_spill] sm:$0xff] }
 0x9da   : >> { %2582 = vperm.xlu0 %3291, %v2568_v31  }
 0x9db   : >> { %2577 = vperm.xlu1 %3292, %v2567_v52  }
 0x9de   : >> { %2592 = vperm.xlu0 %3291, %v2570_v16  }
 0x9df   : >> { %2587 = vperm.xlu1 %3292, %v2569_v21   ;;  %v4992_v21 = vld [vmem:[#allocation87_spill] sm:$0xff] }
 0x9e2   : >> { %2668 = vperm.xlu0 %3291, %v4979_v1   ;;  %v5000_v1 = vld [vmem:[#allocation99_spill] sm:$0xff] }
 0x9e3   : >> { %2663 = vperm.xlu1 %3292, %v4980_v25   ;;  %v4993_v25 = vld [vmem:[#allocation88_spill] sm:$0xff] }
 0xa09   : >> { %v4524_v63 = vpop.permute.xlu0 %2518 }
 0xa0a   : >> { %v4526_v37 = vpop.permute.xlu1 %2513 }
 0xa0b   : >> { %4987 = vst [vmem:[#allocation108_spill] sm:$0xff] %v4526_v37 }
 0xa0d   : >> { %v4528_v10 = vpop.permute.xlu0 %2528 }
 0xa0e   : >> { %v4530_v57 = vpop.permute.xlu1 %2523 }
 0xa11   : >> { %v2539_v5 = vpop.permute.xlu0 %2538 }
 0xa12   : >> { %v2534_v38 = vpop.permute.xlu1 %2533  ;;  %v2561_v0 = vsub.f32 %v4988_v9, %v2539_v5  ;;  %v2562_v13 = vsub.f32 %v4989_v41, %v2539_v5  ;;  %v4994_v9 = vld [vmem:[#allocation85_spill] sm:$0xff] }
 0xa13   : >> { %v2559_v31 = vsub.f32 %v4990_v23, %v2534_v38  ;;  %v2560_v2 = vsub.f32 %v4991_v3, %v2534_v38 }
 0xa15   : >> { %v2549_v62 = vpop.permute.xlu0 %2548 }
 0xa16   : >> { %v2544_v32 = vpop.permute.xlu1 %2543  ;;  %v2565_v24 = vsub.f32 %v5000_v1, %v2549_v62  ;;  %v2566_v28 = vsub.f32 %v4152_v22, %v2549_v62 }
 0xa17   : >> { %v2563_v41 = vsub.f32 %v5001_v18, %v2544_v32  ;;  %v2564_v49 = vsub.f32 %v5002_v61, %v2544_v32 }
 0xa31   : >> { %v2603_v17 = vpop.permute.xlu0 %2602 }
 0xa32   : >> { %v2598_v53 = vpop.permute.xlu1 %2597  ;;  %v2625_v50 = vmul.f32 %v2603_v17, %v2561_v0  ;;  %v2626_v8 = vmul.f32 %v2603_v17, %v2562_v13 }
 0xa33   : >> { %v2623_v16 = vmul.f32 %v2598_v53, %v2559_v31  ;;  %v2624_v12 = vmul.f32 %v2598_v53, %v2560_v2  ;;  %v4998_v53 = vld [vmem:[#allocation89_spill] sm:$0xff] }
 0xa34   : >> { %v2681_v5 = vadd.f32 %v2659_v60, %v2625_v50  ;;  %v2682_v3 = vadd.f32 %v2659_v60, %v2626_v8 }
 0xa35   : >> { %v2613_v33 = vpop.permute.xlu0 %2612  ;;  %v2679_v38 = vadd.f32 %v2654_v19, %v2623_v16  ;;  %v2680_v37 = vadd.f32 %v2654_v19, %v2624_v12 }
 0xa36   : >> { %v2608_v59 = vpop.permute.xlu1 %2607  ;;  %v4564_v0 = vmul.f32 %v2613_v33, %v2565_v24  ;;  %v4566_v17 = vmul.f32 %v2613_v33, %v2566_v28 }
 0xa37   : >> { %v4568_v13 = vmul.f32 %v2608_v59, %v2563_v41  ;;  %v4570_v2 = vmul.f32 %v2608_v59, %v2564_v49 }
 0xa39   : >> { %v2024_v29 = vpop.permute.xlu0 %2023 }
 0xa3a   : >> { %v2029_v35 = vpop.permute.xlu1 %2028  ;;  %v2061_v1 = vsub.f32 %v4197_v54, %v2024_v29  ;;  %v2062_v22 = vsub.f32 %v4199_v51, %v2024_v29 }
 0xa3b   : >> { %v2063_v18 = vsub.f32 %v4203_v56, %v2029_v35  ;;  %v2064_v61 = vsub.f32 %v4209_v45, %v2029_v35 }
 0xa3d   : >> { %v4532_v36 = vpop.permute.xlu0 %2038 }
 0xa3e   : >> { %v4534_v47 = vpop.permute.xlu1 %2033  ;;  %v2067_v24 = vsub.f32 %v4223_v15, %v4532_v36  ;;  %v2068_v28 = vsub.f32 %v4229_v14, %v4532_v36  ;;  %v5004_v36 = vld [vmem:[#allocation101_spill] sm:$0xff] }
 0xa3f   : >> { %v2065_v49 = vsub.f32 %v4217_v4, %v4534_v47  ;;  %v2066_v19 = vsub.f32 %v4219_v44, %v4534_v47 }
 0xa41   : >> { %v2049_v43 = vpop.permute.xlu0 %2048 }
 0xa42   : >> { %v2044_v34 = vpop.permute.xlu1 %2043  ;;  %v2071_v54 = vsub.f32 %v4243_v11, %v2049_v43  ;;  %v2072_v51 = vsub.f32 %v4249_v7, %v2049_v43  ;;  %v5003_v7 = vld [vmem:[#allocation100_spill] sm:$0xff] }
 0xa43   : >> { %v2069_v62 = vsub.f32 %v4237_v20, %v2044_v34  ;;  %v2070_v15 = vsub.f32 %v4239_v42, %v2044_v34 }
 0xa45   : >> { %v4536_v48 = vpop.permute.xlu0 %2058 }
 0xa46   : >> { %v4542_v52 = vpop.permute.xlu1 %2053  ;;  %v2075_v4 = vsub.f32 %v4263_v55, %v4536_v48  ;;  %v2076_v44 = vsub.f32 %v4269_v6, %v4536_v48 }
 0xa47   : >> { %v2073_v35 = vsub.f32 %v5003_v7, %v4542_v52  ;;  %v2074_v20 = vsub.f32 %v5004_v36, %v4542_v52 }
 0xa49   : >> { %v2093_v23 = vpop.permute.xlu0 %2092 }
 0xa4a   : >> { %v2088_v40 = vpop.permute.xlu1 %2087  ;;  %v2127_v56 = vmul.f32 %v2093_v23, %v2063_v18  ;;  %v2128_v45 = vmul.f32 %v2093_v23, %v2064_v61 }
 0xa4b   : >> { %v2125_v32 = vmul.f32 %v2088_v40, %v2061_v1  ;;  %v2126_v33 = vmul.f32 %v2088_v40, %v2062_v22 }
 0xa4c   : >> { %v2183_v40 = vadd.f32 %v4500_v27, %v2127_v56  ;;  %v2184_v55 = vadd.f32 %v4500_v27, %v2128_v45 }
 0xa4d   : >> { %v2103_v31 = vpop.permute.xlu0 %2102  ;;  %v2181_v34 = vadd.f32 %v4502_v39, %v2125_v32  ;;  %v2182_v48 = vadd.f32 %v4502_v39, %v2126_v33  ;;  %v5009_v33 = vld [vmem:[#allocation86_spill] sm:$0xff] }
 0xa4e   : >> { %v2098_v60 = vpop.permute.xlu1 %2097  ;;  %v2131_v16 = vmul.f32 %v2103_v31, %v2067_v24  ;;  %v2132_v12 = vmul.f32 %v2103_v31, %v2068_v28 }
 0xa4f   : >> { %v2129_v27 = vmul.f32 %v2098_v60, %v2065_v49 }
 0xa50   : >> { %v2188_v56 = vadd.f32 %v4504_v58, %v2132_v12 }
 0xa51   : >> { %v2113_v14 = vpop.permute.xlu0 %2112  ;;  %v2185_v45 = vadd.f32 %v4506_v26, %v2129_v27 }
 0xa52   : >> { %v2135_v59 = vmul.f32 %v2113_v14, %v2071_v54  ;;  %v2136_v11 = vmul.f32 %v2113_v14, %v2072_v51  ;;  %v2108_v29 = vpop.permute.xlu1 %2107  ;;  %v2187_v51 = vadd.f32 %v4504_v58, %v2131_v16 }
 0xa53   : >> { %v2133_v47 = vmul.f32 %v2108_v29, %v2069_v62  ;;  %v2134_v42 = vmul.f32 %v2108_v29, %v2070_v15  ;;  %v5007_v15 = vld [vmem:[#allocation108_spill] sm:$0xff]  ;;  %v5013_v29 = vld [vmem:[#allocation103_spill] sm:$0xff] }
 0xa54   : >> { %v2191_v43 = vadd.f32 %v4508_v30, %v2135_v59  ;;  %v2192_v6 = vadd.f32 %v4508_v30, %v2136_v11  ;;  %v2130_v30 = vmul.f32 %v2098_v60, %v2066_v19  ;;  %v5006_v60 = vsub.f32 %v4993_v25, %v4524_v63  ;;  %v5012_v25 = vld [vmem:[#allocation104_spill] sm:$0xff] }
 0xa55   : >> { %v2189_v50 = vadd.f32 %v4510_v46, %v2133_v47  ;;  %v2190_v52 = vadd.f32 %v4510_v46, %v2134_v42  ;;  %v2123_v8 = vpop.permute.xlu0 %2122  ;;  %v5008_v58 = vsub.f32 %v4994_v9, %v5007_v15  ;;  %v5010_v14 = vsub.f32 %v5009_v33, %v5007_v15 }
 0xa56   : >> { %v2697_v41 = vadd.f32 %v2681_v5, %v2191_v43  ;;  %v2698_v23 = vadd.f32 %v2682_v3, %v2192_v6  ;;  %v2118_v1 = vpop.permute.xlu1 %2117  ;;  %v2139_v54 = vmul.f32 %v2123_v8, %v2075_v4  ;;  %v2140_v46 = vmul.f32 %v2123_v8, %v2076_v44  ;;  %v5011_v4 = vld [vmem:[#allocation102_spill] sm:$0xff]  ;;  %v5015_v43 = vld [vmem:[#allocation91_spill] sm:$0xff] }
 0xa57   : >> { %v2695_v22 = vadd.f32 %v2679_v38, %v2189_v50  ;;  %v2696_v18 = vadd.f32 %v2680_v37, %v2190_v52  ;;  %v2137_v5 = vmul.f32 %v2118_v1, %v2073_v35  ;;  %v2138_v3 = vmul.f32 %v2118_v1, %v2074_v20  ;;  %v5014_v35 = vld [vmem:[#allocation105_spill] sm:$0xff]  ;;  %v5017_v52 = vld [vmem:[#allocation92_spill] sm:$0xff] }
 0xa58   : >> { %v2713_v39 = vmax.f32 %v2697_v41, 0.0  ;;  %v2714_v61 = vmax.f32 %v2698_v23, 0.0  ;;  %v5005_v37 = vsub.f32 %v4992_v21, %v4524_v63  ;;  %v2186_v62 = vadd.f32 %v4506_v26, %v2130_v30  ;;  %v5020_v30 = vld [vmem:[#allocation90_spill] sm:$0xff] }
 0xa59   : >> { %v2711_v24 = vmax.f32 %v2695_v22, 0.0  ;;  %v2712_v31 = vmax.f32 %v2696_v18, 0.0  ;;  %v2583_v28 = vpop.permute.xlu0 %2582  ;;  %v2195_v44 = vadd.f32 %v5011_v4, %v2139_v54  ;;  %v2196_v63 = vadd.f32 %v5011_v4, %v2140_v46 }
 0xa5a   : >> { %2732 = vst [vmem:[%s4607_s17 + $0x50] sm:$0xff] %v2713_v39  ;;  %2733 = vst [vmem:[%s4607_s17 + $0x58] sm:$0xff] %v2714_v61  ;;  %v2617_v38 = vmul.f32 %v2583_v28, %v5005_v37  ;;  %v2618_v49 = vmul.f32 %v2583_v28, %v5006_v60  ;;  %v2578_v19 = vpop.permute.xlu1 %2577  ;;  %v2193_v26 = vadd.f32 %v5013_v29, %v2137_v5  ;;  %v5022_v39 = vld [vmem:[#allocation106_spill] sm:$0xff] }
 0xa5b   : >> { %2730 = vst [vmem:[%s4607_s17 + $0x40] sm:$0xff] %v2711_v24  ;;  %2731 = vst [vmem:[%s4607_s17 + $0x48] sm:$0xff] %v2712_v31  ;;  %v2615_v32 = vmul.f32 %v2578_v19, %v5008_v58  ;;  %v2616_v21 = vmul.f32 %v2578_v19, %v5010_v14  ;;  %v2194_v7 = vadd.f32 %v5013_v29, %v2138_v3 }
 0xa5c   : >> { %v2673_v59 = vadd.f32 %v5012_v25, %v2617_v38  ;;  %v2674_v11 = vadd.f32 %v5012_v25, %v2618_v49  ;;  %v5016_v6 = vsub.f32 %v5015_v43, %v4528_v10  ;;  %v5018_v8 = vsub.f32 %v5017_v52, %v4528_v10 }
 0xa5d   : >> { %v2671_v36 = vadd.f32 %v5014_v35, %v2615_v32  ;;  %v2672_v9 = vadd.f32 %v5014_v35, %v2616_v21  ;;  %v2593_v20 = vpop.permute.xlu0 %2592  ;;  %v5019_v1 = vsub.f32 %v4998_v53, %v4530_v57 }
 0xa5e   : >> { %v2689_v47 = vadd.f32 %v2673_v59, %v2183_v40  ;;  %v2690_v42 = vadd.f32 %v2674_v11, %v2184_v55  ;;  %v2621_v50 = vmul.f32 %v2593_v20, %v5016_v6  ;;  %v2622_v16 = vmul.f32 %v2593_v20, %v5018_v8  ;;  %v2588_v12 = vpop.permute.xlu1 %2587 }
 0xa5f   : >> { %v2687_v41 = vadd.f32 %v2671_v36, %v2181_v34  ;;  %v2688_v23 = vadd.f32 %v2672_v9, %v2182_v48  ;;  %v2619_v27 = vmul.f32 %v2588_v12, %v5019_v1  ;;  %v5021_v40 = vsub.f32 %v5020_v30, %v4530_v57  ;;  %v5023_v34 = vld [vmem:[#allocation107_spill] sm:$0xff] }
 0xa60   : >> { %v2705_v22 = vmax.f32 %v2689_v47, 0.0  ;;  %v2706_v18 = vmax.f32 %v2690_v42, 0.0  ;;  %v2677_v10 = vadd.f32 %v5022_v39, %v2621_v50  ;;  %v2678_v61 = vadd.f32 %v5022_v39, %v2622_v16 }
 0xa61   : >> { %v2620_v55 = vmul.f32 %v2588_v12, %v5021_v40  ;;  %v2703_v54 = vmax.f32 %v2687_v41, 0.0  ;;  %v2704_v46 = vmax.f32 %v2688_v23, 0.0  ;;  %v2675_v48 = vadd.f32 %v5023_v34, %v2619_v27  ;;  %v2669_v53 = vpop.permute.xlu0 %2668 }
 0xa62   : >> { %2724 = vst [vmem:[%s4607_s17 + $0x10] sm:$0xff] %v2705_v22  ;;  %2725 = vst [vmem:[%s4607_s17 + $0x18] sm:$0xff] %v2706_v18  ;;  %v2693_v31 = vadd.f32 %v2677_v10, %v2187_v51  ;;  %v2694_v57 = vadd.f32 %v2678_v61, %v2188_v56  ;;  %v2685_v5 = vadd.f32 %v2669_v53, %v4564_v0  ;;  %v2664_v28 = vpop.permute.xlu1 %2663 }
 0xa63   : >> { %v2676_v24 = vadd.f32 %v5023_v34, %v2620_v55  ;;  %v2686_v3 = vadd.f32 %v2669_v53, %v4566_v17  ;;  %2722 = vst [vmem:[%s4607_s17] sm:$0xff] %v2703_v54  ;;  %2723 = vst [vmem:[%s4607_s17 + $0x8] sm:$0xff] %v2704_v46  ;;  %v2691_v37 = vadd.f32 %v2675_v48, %v2185_v45 }
 0xa64   : >> { %v2683_v60 = vadd.f32 %v2664_v28, %v4568_v13  ;;  %v2684_v49 = vadd.f32 %v2664_v28, %v4570_v2  ;;  %v2709_v19 = vmax.f32 %v2693_v31, 0.0  ;;  %v2710_v51 = vmax.f32 %v2694_v57, 0.0 }
 0xa65   : >> { %v2692_v38 = vadd.f32 %v2676_v24, %v2186_v62  ;;  %v2701_v0 = vadd.f32 %v2685_v5, %v2195_v44  ;;  %v2702_v17 = vadd.f32 %v2686_v3, %v2196_v63  ;;  %v2707_v56 = vmax.f32 %v2691_v37, 0.0  ;;  %607 = sbr.rel (!%p605_p11) target bundleno = 67 (0x43), region = 127 }
 0xa66   : >> { %v2699_v58 = vadd.f32 %v2683_v60, %v2193_v26  ;;  %v2700_v32 = vadd.f32 %v2684_v49, %v2194_v7  ;;  %2728 = vst [vmem:[%s4607_s17 + $0x30] sm:$0xff] %v2709_v19  ;;  %2729 = vst [vmem:[%s4607_s17 + $0x38] sm:$0xff] %v2710_v51 }
 0xa67   : >> { %v2708_v15 = vmax.f32 %v2692_v38, 0.0  ;;  %v2717_v45 = vmax.f32 %v2701_v0, 0.0  ;;  %v2718_v62 = vmax.f32 %v2702_v17, 0.0  ;;  %2726 = vst [vmem:[%s4607_s17 + $0x20] sm:$0xff] %v2707_v56 }
 0xa68   : >> { %v2715_v13 = vmax.f32 %v2699_v58, 0.0  ;;  %v2716_v2 = vmax.f32 %v2700_v32, 0.0 }
 0xa69   : >> { %2727 = vst [vmem:[%s4607_s17 + $0x28] sm:$0xff] %v2708_v15  ;;  %2736 = vst [vmem:[%s4607_s17 + $0x70] sm:$0xff] %v2717_v45 }
 0xa6a   : >> { %2737 = vst [vmem:[%s4607_s17 + $0x78] sm:$0xff] %v2718_v62  ;;  %2734 = vst [vmem:[%s4607_s17 + $0x60] sm:$0xff] %v2715_v13 }
 0xa6b   : >> { %2735 = vst [vmem:[%s4607_s17 + $0x68] sm:$0xff] %v2716_v2  ;;  %s3348_s17 = scalar_lea.vmem (%p605_p11), %s3347_s30, 8192 }
 0xa6c   : > { %p3350_p2 = scmp.lt.s32.totalorder %s3348_s17, %s3342_s23 }
 0xa6e   : > { %p3351_p3 = por %p3350_p2, %p3349_p1 }
 0xa70   : > { %p3352_p4 = pnand %p3351_p3, %p3345_p0 }
 0xa72   : > { %3355 = shalt.err (!%p3352_p4)
}
 0xa73   : > { %s3356_s25 = scalar_lea.hbm %s4676_s26, 4096  ;;  %s3360_s20 = scalar_lea.hbm %s4740_s15, 8192 }
 0xa74   : > { %p3357_p7 = scmp.ne.s32.totalorder %s4676_s26, %s3356_s25  ;;  %p3361_p10 = scmp.lt.u32.totalorder %s4676_s26, %s4740_s15 }
 0xa75   : > { %p3362_p11 = scmp.lt.u32.totalorder %s3360_s20, %s3356_s25  ;;  %p3364_p13 = scmp.lt.u32.totalorder %s3356_s25, %s4676_s26 }
 0xa76   : > { %p3358_p8 = pnand %p3357_p7, %p3541_p5 }
 0xa77   : > { %p3363_p12 = por %p3362_p11, %p3361_p10 }
 0xa78   : > { %p3359_p9 = pneg %p3358_p8 }
 0xa79   : > { %p3365_p0 = por %p3364_p13, %p3363_p12 }
 0xa7b   : > { %p3366_p1 = pnand %p3365_p0, %p3359_p9 }
 0xa7d   : > { %3369 = shalt.err (!%p3366_p1)
}
 0xa7e   : > { %s3421_s23 = smov 256   ;;  %s3422_s22 = smov 16  }
 0xa7f   : > { %3236 = dma.vmem_to_hbm [thread:$0]  (%p3541_p5), %s4680_s27, 4096, %s4676_s26, %s4684_s24, %s3421_s23, %s3421_s23, %s3422_s22  }
 0xa80 PF: > { %s5025_s30 = sld [smem:[#allocation8_spill]]  ;;  %s5026_s17 = sld [smem:[#allocation6_spill]] }
 0xa86   : > { %p3242_p2 = scmp.ge.s32.totalorder %s5025_s30, 2  ;;  %s2768_s16 = sand.u32 1, %s5026_s17  }
 0xa87   : > { %s2769_s25 = scalar_lea.sflag [#allocation4], %s2768_s16 }
 0xa88   : > { %p3239_p3 = pnand %p3242_p2, %p3545_p6 }
 0xa8a   : > { %3391 = dma.done.wait (!%p3239_p3), %s2769_s25, 4096  }
 0xa8b   : > { %3393 = vsyncadd (!%p3239_p3), %s2769_s25, 4294963200  ;;  %s5028_s21 = sld [smem:[#allocation9_spill]]  ;;  %s5029_s20 = sld [smem:[#allocation7_spill]] }
 0xa8c   : > { %s5030_s29 = sld [smem:[#allocation10_spill]]  ;;  %s5031_s18 = smov %s3400_s19 }
 0xa91   : > { %p25_p4 = scmp.ge.s32.totalorder %s5028_s21, 4   ;;  %s5032_s19 = smov %s5029_s20 }
 0xa92   : > { %s5033_s20 = smov %s5030_s29 }
 0xa93   :  { %27 = sbr.rel (!%p25_p4) target bundleno = 3 (0x3), region = 138 }
 0xa9a   :  { %2774 = vsyncpa [#allocation4], 1 }
 0xa9b   :  { %2776 = vsyncpa [#allocation4 + $0x1], 1 }

</bundles_post_ra>
